<compile_context>
chip_gen: v7x
topology: tpu7x:2x2x1
jax: 0.10.0
libtpu: 0.0.40
codegen_flags: <defaults>
</compile_context>

<pallas_src>
import functools

import jax
import jax.numpy as jnp
from jax.experimental import pallas as pl
from jax.experimental.pallas import tpu as pltpu  # noqa: F401  (TPU backend)


# ------------------------------- Pallas kernels ------------------------------

def _conv_kernel(p_ref, w_ref, pk_ref, o_ref, *, bn, act, out_t,
                 bn_eps, slope, inv_m):
    """Fused conv-as-matmul + bias + BatchNorm(batch stats) + activation.

    out_t=False: p (M,K) @ w (K,O) -> (M,O); pk is (3,O) rows [bias;gamma;beta].
    out_t=True : w (O,K) @ pT (K,M) -> (O,M) lane-dense store; pk is (O,3)
                 columns [bias,gamma,beta] (or (O,1) bias-only when bn=False).
    """
    if out_t:
        y = jnp.dot(w_ref[...], p_ref[...], preferred_element_type=jnp.float32)
        y = y + pk_ref[:, 0:1]
        if bn:
            s = jnp.sum(y, axis=1, keepdims=True)
            ss = jnp.sum(y * y, axis=1, keepdims=True)
            mean = s * inv_m
            var = jnp.maximum(ss * inv_m - mean * mean, 0.0)
            scale = pk_ref[:, 1:2] * jax.lax.rsqrt(var + bn_eps)
            y = (y - mean) * scale + pk_ref[:, 2:3]
    else:
        y = jnp.dot(p_ref[...], w_ref[...], preferred_element_type=jnp.float32)
        y = y + pk_ref[0:1, :]
        if bn:
            s = jnp.sum(y, axis=0, keepdims=True)
            ss = jnp.sum(y * y, axis=0, keepdims=True)
            mean = s * inv_m
            var = jnp.maximum(ss * inv_m - mean * mean, 0.0)
            scale = pk_ref[1:2, :] * jax.lax.rsqrt(var + bn_eps)
            y = (y - mean) * scale + pk_ref[2:3, :]
    if act == "leaky":
        y = jnp.where(y >= 0, y, slope * y)
    elif act == "tanh":
        y = jnp.tanh(y)
    o_ref[...] = y.astype(o_ref.dtype)


def _ct_kernel(p_ref, w_ref, pk_ref, o_ref, *, c_out, bn_eps, slope, inv_m):
    """Sub-pixel ConvTranspose block, transposed orientation.

    w (4*C_out, 4*C_in) @ patchesT (4*C_in, M) -> y (4*C_out, M), rows indexed
    p*C_out + c (p = output sub-pixel phase).  BatchNorm statistics run over
    M columns x 4 phase row-blocks: fold = static sublane slices + adds,
    broadcast back = axis-0 concatenate (no extra operands / matmuls).
    pk is (4*C_out, 3): columns [bias, gamma, beta] already phase-tiled.
    """
    y = jnp.dot(w_ref[...], p_ref[...], preferred_element_type=jnp.float32)
    y = y + pk_ref[:, 0:1]
    s4 = jnp.sum(y, axis=1, keepdims=True)            # (4C, 1)
    ss4 = jnp.sum(y * y, axis=1, keepdims=True)
    C = c_out
    s = s4[0:C] + s4[C:2 * C] + s4[2 * C:3 * C] + s4[3 * C:4 * C]      # (C,1)
    ss = ss4[0:C] + ss4[C:2 * C] + ss4[2 * C:3 * C] + ss4[3 * C:4 * C]
    mean = s * inv_m
    var = jnp.maximum(ss * inv_m - mean * mean, 0.0)
    inv_std = jax.lax.rsqrt(var + bn_eps)
    mean4 = jnp.concatenate([mean] * 4, axis=0)        # (4C,1)
    inv4 = jnp.concatenate([inv_std] * 4, axis=0)
    scale4 = pk_ref[:, 1:2] * inv4
    y = (y - mean4) * scale4 + pk_ref[:, 2:3]
    o_ref[...] = jnp.where(y >= 0, y, slope * y).astype(o_ref.dtype)


def _latent_kernel(x_ref, wmu_ref, wv_ref, bmv_ref, eps_ref, wd_ref, bd_ref,
                   mu_ref, lv_ref, d_ref):
    """fc_mu + fc_var + reparameterise + decoder_input fused in one kernel."""
    x = x_ref[...]
    mu = jnp.dot(x, wmu_ref[...], preferred_element_type=jnp.float32) + bmv_ref[0:1, :]
    lv = jnp.dot(x, wv_ref[...], preferred_element_type=jnp.float32) + bmv_ref[1:2, :]
    z = eps_ref[...] * jnp.exp(0.5 * lv) + mu
    d = jnp.dot(z, wd_ref[...], preferred_element_type=jnp.float32) + bd_ref[...]
    mu_ref[...] = mu
    lv_ref[...] = lv
    d_ref[...] = d


# ------------------------------- pallas_call wrappers ------------------------

def _full_spec(shape):
    return pl.BlockSpec(shape, lambda i: (0,) * len(shape))


def conv_block(patches, w, pack, *, bn, act, out_t, inv_m):
    if out_t:
        O, M = w.shape[0], patches.shape[1]
        out_shape = (O, M)
    else:
        M, O = patches.shape[0], w.shape[1]
        out_shape = (M, O)
    kern = functools.partial(_conv_kernel, bn=bn, act=act, out_t=out_t,
                             bn_eps=1e-5, slope=0.01, inv_m=inv_m)
    return pl.pallas_call(
        kern,
        out_shape=jax.ShapeDtypeStruct(out_shape, jnp.float32),
        grid=(1,),
        in_specs=[_full_spec(patches.shape), _full_spec(w.shape),
                  _full_spec(pack.shape)],
        out_specs=_full_spec(out_shape),
    )(patches, w, pack)


def ct_block(patches_t, w_t, pack):
    K4, M = patches_t.shape
    O4 = w_t.shape[0]
    c_out = O4 // 4
    kern = functools.partial(_ct_kernel, c_out=c_out, bn_eps=1e-5, slope=0.01,
                             inv_m=1.0 / (M * 4))
    return pl.pallas_call(
        kern,
        out_shape=jax.ShapeDtypeStruct((O4, M), jnp.float32),
        grid=(1,),
        in_specs=[_full_spec((K4, M)), _full_spec((O4, K4)),
                  _full_spec((O4, 3))],
        out_specs=_full_spec((O4, M)),
    )(patches_t, w_t, pack)


def latent_block(flat, lat, eps):
    B, F = flat.shape
    L = lat["Wmu"].shape[1]
    return pl.pallas_call(
        _latent_kernel,
        out_shape=(jax.ShapeDtypeStruct((B, L), jnp.float32),
                   jax.ShapeDtypeStruct((B, L), jnp.float32),
                   jax.ShapeDtypeStruct((B, F), jnp.float32)),
        grid=(1,),
        in_specs=[_full_spec((B, F)), _full_spec((F, L)), _full_spec((F, L)),
                  _full_spec((2, L)), _full_spec((B, L)),
                  _full_spec((L, F)), _full_spec((1, F))],
        out_specs=(_full_spec((B, L)), _full_spec((B, L)), _full_spec((B, F))),
    )(flat, lat["Wmu"], lat["Wv"], lat["bmv"], eps, lat["Wd"], lat["bd"])


# ------------------------------- layout glue (jit-fused XLA) -----------------

def _im2col3x3_nhwc(x, stride, pad):
    """Channels-last im2col; feature ordering is tap-major: (3*kh+kw)*C + c."""
    N, H, W, C = x.shape
    xp = jnp.pad(x, ((0, 0), (pad, pad), (pad, pad), (0, 0)))
    Ho = (H + 2 * pad - 3) // stride + 1
    Wo = (W + 2 * pad - 3) // stride + 1
    taps = []
    for kh in range(3):
        for kw in range(3):
            taps.append(xp[:, kh:kh + stride * (Ho - 1) + 1:stride,
                            kw:kw + stride * (Wo - 1) + 1:stride, :])
    patches = jnp.concatenate(taps, axis=-1)          # (N, Ho, Wo, 9C)
    return patches.reshape(N * Ho * Wo, 9 * C), (N, Ho, Wo)


def _subpixel_patches_t(h):
    """(N,H,W,C) -> (4C, N*H*W): 2x2 input neighbourhood, row blocks q=2dm+dn."""
    N, H, W, C = h.shape
    hp = jnp.pad(h, ((0, 0), (0, 1), (0, 1), (0, 0)))
    nbrs = [hp[:, :H, :W, :], hp[:, :H, 1:, :],
            hp[:, 1:, :W, :], hp[:, 1:, 1:, :]]
    return jnp.concatenate(nbrs, axis=-1).reshape(N * H * W, 4 * C).T


def _subpixel_assemble_t(y, N, H, W, c_out):
    """(4*c_out, N*H*W) transposed phase-major -> (N, 2H, 2W, c_out)."""
    y = y.reshape(2, 2, c_out, N, H, W)               # (a, b, c, n, h, w)
    y = jnp.transpose(y, (3, 4, 0, 5, 1, 2))          # (n, h, a, w, b, c)
    return y.reshape(N, 2 * H, 2 * W, c_out)


# ------------------------------- weight re-layout (one-time) -----------------

def _conv_weight_mat(w):
    """PyTorch Conv2d weight (O, C, 3, 3) -> (9C, O), rows tap-major."""
    O = w.shape[0]
    return jnp.transpose(w, (2, 3, 1, 0)).reshape(-1, O)


def _subpixel_weight(wt):
    """PyTorch ConvTranspose2d weight (C_in, C_out, 3, 3) -> (4*C_in, 4*C_out).

    Output column block p = 2*a+b (output row/col parity); input row block
    q = 2*dm+dn (neighbour offset): out[2m+a,2n+b] += in[m+dm,n+dn]*W[kh,kw]
    with kh = a+1-2*dm, kw = b+1-2*dn (zero block if the tap is out of range).
    """
    c_in, c_out = wt.shape[0], wt.shape[1]
    zero = jnp.zeros((c_in, c_out), wt.dtype)
    rows = []
    for dm in (0, 1):
        for dn in (0, 1):
            cols = []
            for a in (0, 1):
                for b in (0, 1):
                    kh, kw = a + 1 - 2 * dm, b + 1 - 2 * dn
                    ok = (0 <= kh <= 2) and (0 <= kw <= 2)
                    cols.append(wt[:, :, kh, kw] if ok else zero)
            rows.append(jnp.concatenate(cols, axis=1))
    return jnp.concatenate(rows, axis=0)


def prepare_params(params):
    """One-time re-layout of torch-style params into matmul-ready operands."""
    prep = {"enc": [], "dec": []}
    for idx, layer in enumerate(params["enc"]):
        wmat = _conv_weight_mat(layer["W"])                      # (9C_in, O)
        if idx == 0:   # transposed orientation (lane-dense (O, M) output)
            prep["enc"].append(dict(
                W=wmat.T,                                        # (O, 9C_in)
                pack=jnp.stack([layer["b"], layer["gamma"], layer["beta"]],
                               axis=1)))                         # (O, 3)
        else:
            prep["enc"].append(dict(
                W=wmat,
                pack=jnp.stack([layer["b"], layer["gamma"], layer["beta"]],
                               axis=0)))                         # (3, O)
    feat = params["dec_in"]["W"].shape[0]
    prep["latent"] = dict(
        Wmu=params["fc_mu"]["W"].T, Wv=params["fc_var"]["W"].T,
        bmv=jnp.stack([params["fc_mu"]["b"], params["fc_var"]["b"]], axis=0),
        Wd=params["dec_in"]["W"].T, bd=params["dec_in"]["b"].reshape(1, feat))
    for layer in params["dec"] + [params["final_ct"]]:
        prep["dec"].append(dict(
            W=_subpixel_weight(layer["W"]).T,                    # (4C_out, 4C_in)
            pack=jnp.stack([jnp.tile(layer["b"], 4),
                            jnp.tile(layer["gamma"], 4),
                            jnp.tile(layer["beta"], 4)], axis=1)))  # (4C_out, 3)
    fc = params["final_conv"]
    prep["final_conv"] = dict(W=_conv_weight_mat(fc["W"]).T,     # (O, 9C)
                              pack=fc["b"].reshape(-1, 1))       # (O, 1) bias only
    return prep


# ------------------------------- parameters ----------------------------------

def init_params(key, in_channels, latent_dim, hidden_dims):
    keys = iter(jax.random.split(key, 64))

    def nrm(shape, scale=0.1):
        return scale * jax.random.normal(next(keys), shape, dtype=jnp.float32)

    params = {}
    enc, cin = [], in_channels
    for h in hidden_dims:
        enc.append(dict(W=nrm((h, cin, 3, 3)), b=nrm((h,)),
                        gamma=jnp.ones((h,), jnp.float32),
                        beta=jnp.zeros((h,), jnp.float32)))
        cin = h
    params["enc"] = enc

    feat = hidden_dims[-1] * 4
    params["fc_mu"] = dict(W=nrm((latent_dim, feat)), b=nrm((latent_dim,)))
    params["fc_var"] = dict(W=nrm((latent_dim, feat)), b=nrm((latent_dim,)))
    params["dec_in"] = dict(W=nrm((feat, latent_dim)), b=nrm((feat,)))

    rev = list(reversed(hidden_dims))
    dec = []
    for i in range(len(rev) - 1):
        dec.append(dict(W=nrm((rev[i], rev[i + 1], 3, 3)), b=nrm((rev[i + 1],)),
                        gamma=jnp.ones((rev[i + 1],), jnp.float32),
                        beta=jnp.zeros((rev[i + 1],), jnp.float32)))
    params["dec"] = dec
    params["final_ct"] = dict(W=nrm((rev[-1], rev[-1], 3, 3)), b=nrm((rev[-1],)),
                              gamma=jnp.ones((rev[-1],), jnp.float32),
                              beta=jnp.zeros((rev[-1],), jnp.float32))
    params["final_conv"] = dict(W=nrm((in_channels, rev[-1], 3, 3)),
                                b=nrm((in_channels,)))
    return params


# ------------------------------- VAE forward ---------------------------------

def vae_forward(prep, x, eps, hidden_dims, auto_normalise=False):
    if auto_normalise:
        x = x * 2.0 - 1.0                                  # normalise_data

    h = jnp.transpose(x, (0, 2, 3, 1))                     # NCHW -> NHWC, once

    # encoder: fused [Conv(3x3, s=2, p=1) + BN + LeakyReLU] per layer
    for idx, layer in enumerate(prep["enc"]):
        patches, (N, Ho, Wo) = _im2col3x3_nhwc(h, stride=2, pad=1)
        M = N * Ho * Wo
        if idx == 0:   # lane-dense (O, M) orientation
            O = layer["W"].shape[0]
            y = conv_block(patches.T, layer["W"], layer["pack"],
                           bn=True, act="leaky", out_t=True, inv_m=1.0 / M)
            h = jnp.transpose(y.reshape(O, N, Ho, Wo), (1, 2, 3, 0))
        else:
            O = layer["W"].shape[1]
            y = conv_block(patches, layer["W"], layer["pack"],
                           bn=True, act="leaky", out_t=False, inv_m=1.0 / M)
            h = y.reshape(N, Ho, Wo, O)

    N = h.shape[0]
    # match torch.flatten(result, start_dim=1) on the NCHW tensor (2x2 spatial)
    flat = jnp.transpose(h, (0, 3, 1, 2)).reshape(N, -1)

    # fc_mu + fc_var + reparameterise + decoder_input fused in one kernel
    mu, log_var, d = latent_block(flat, prep["latent"], eps)

    rev = list(reversed(hidden_dims))
    h = d.reshape(N, rev[0], 2, 2).transpose(0, 2, 3, 1)   # NCHW .view -> NHWC

    # decoder + final ConvTranspose: sub-pixel matmul fused with BN + LeakyReLU
    for layer in prep["dec"]:
        c_out = layer["W"].shape[0] // 4
        Hh, Ww = h.shape[1], h.shape[2]
        y = ct_block(_subpixel_patches_t(h), layer["W"], layer["pack"])
        h = _subpixel_assemble_t(y, N, Hh, Ww, c_out)

    # final Conv2d(3x3, s=1, p=1) + Tanh (no BN); lane-dense (O, 512) store
    fc = prep["final_conv"]
    O = fc["W"].shape[0]
    patches, (_, Ho, Wo) = _im2col3x3_nhwc(h, stride=1, pad=1)
    y = conv_block(patches.T, fc["W"], fc["pack"],
                   bn=False, act="tanh", out_t=True, inv_m=1.0)
    recons = jnp.transpose(y.reshape(O, N, Ho, Wo), (1, 0, 2, 3))  # back to NCHW
    return recons, mu, log_var


# ------------------------------- main -----------------------------------------

if __name__ == "__main__":
    in_channels, latent_dim = 4, 8
    hidden_dims = [8, 16, 32]          # 3 stride-2 convs: 16 -> 8 -> 4 -> 2
    B, H = 2, 16

    key = jax.random.PRNGKey(0)
    kp, kx, ke = jax.random.split(key, 3)
    params = init_params(kp, in_channels, latent_dim, hidden_dims)
    prep = prepare_params(params)      # one-time matmul-layout re-packing
    x = jax.random.uniform(kx, (B, in_channels, H, H), dtype=jnp.float32)
    eps = jax.random.normal(ke, (B, latent_dim), dtype=jnp.float32)  # randn_like(std)

    fwd = jax.jit(functools.partial(vae_forward, hidden_dims=hidden_dims,
                                    auto_normalise=False))
    recons, mu, log_var = fwd(prep, x, eps)
    jax.block_until_ready((recons, mu, log_var))

    assert recons.shape == (B, in_channels, H, H)
    assert mu.shape == (B, latent_dim) and log_var.shape == (B, latent_dim)
    assert bool(jnp.all(jnp.isfinite(recons))) and bool(jnp.all(jnp.abs(recons) <= 1.0))
    print("KERNEL_OK")
</pallas_src>

<mosaic_0001>
module attributes {stable_mosaic.version = 11 : i64} {
  func.func @_conv_kernel(%arg0: i32, %arg1: memref<36x128xf32, #tpu.memory_space<vmem>>, %arg2: memref<8x36xf32, #tpu.memory_space<vmem>>, %arg3: memref<8x3xf32, #tpu.memory_space<vmem>>, %arg4: memref<8x128xf32, #tpu.memory_space<vmem>>) attributes {dimension_semantics = [#tpu.dimension_semantics<arbitrary>], iteration_bounds = array<i64: 1>, scalar_prefetch = 0 : i64, scratch_operands = 0 : i64, tpu.core_type = #tpu.core_type<tc>, window_params = [{pipeline_mode = #tpu.pipeline_mode<synchronous>, transform_indices = @transform_0, window_bounds = array<i64: 36, 128>}, {pipeline_mode = #tpu.pipeline_mode<synchronous>, transform_indices = @transform_1, window_bounds = array<i64: 8, 36>}, {pipeline_mode = #tpu.pipeline_mode<synchronous>, transform_indices = @transform_2, window_bounds = array<i64: 8, 3>}, {pipeline_mode = #tpu.pipeline_mode<synchronous>, transform_indices = @transform_3, window_bounds = array<i64: 8, 128>}]} {
    %c0 = arith.constant 0 : index
    %c0_0 = arith.constant 0 : index
    %0 = vector.load %arg2[%c0, %c0_0] : memref<8x36xf32, #tpu.memory_space<vmem>>, vector<8x36xf32>
    %c0_1 = arith.constant 0 : index
    %c0_2 = arith.constant 0 : index
    %1 = vector.load %arg1[%c0_1, %c0_2] : memref<36x128xf32, #tpu.memory_space<vmem>>, vector<36x128xf32>
    %cst = arith.constant dense<0.000000e+00> : vector<8x128xf32>
    %2 = tpu.matmul %0, %1, %cst {dimension_numbers = #tpu.dot_dimension_numbers<[1], [0], [0], [1], [0, 0, 1, 1], [], []>} : vector<8x36xf32>, vector<36x128xf32>, vector<8x128xf32> -> vector<8x128xf32>
    %c0_3 = arith.constant 0 : index
    %c0_4 = arith.constant 0 : index
    %3 = vector.load %arg3[%c0_3, %c0_4] : memref<8x3xf32, #tpu.memory_space<vmem>>, vector<8x1xf32>
    %4 = vector.broadcast %3 : vector<8x1xf32> to vector<8x128xf32>
    %5 = arith.addf %2, %4 : vector<8x128xf32>
    %cst_5 = arith.constant dense<0.000000e+00> : vector<8xf32>
    %6 = vector.multi_reduction <add>, %5, %cst_5 [1] : vector<8x128xf32> to vector<8xf32>
    %7 = vector.shape_cast %6 : vector<8xf32> to vector<8x1xf32>
    %8 = arith.mulf %5, %5 : vector<8x128xf32>
    %cst_6 = arith.constant dense<0.000000e+00> : vector<8xf32>
    %9 = vector.multi_reduction <add>, %8, %cst_6 [1] : vector<8x128xf32> to vector<8xf32>
    %10 = vector.shape_cast %9 : vector<8xf32> to vector<8x1xf32>
    %cst_7 = arith.constant 7.812500e-03 : f32
    %11 = vector.broadcast %cst_7 : f32 to vector<8x1xf32>
    %12 = arith.mulf %7, %11 : vector<8x1xf32>
    %cst_8 = arith.constant 7.812500e-03 : f32
    %13 = vector.broadcast %cst_8 : f32 to vector<8x1xf32>
    %14 = arith.mulf %10, %13 : vector<8x1xf32>
    %15 = arith.mulf %12, %12 : vector<8x1xf32>
    %16 = arith.subf %14, %15 : vector<8x1xf32>
    %cst_9 = arith.constant 0.000000e+00 : f32
    %17 = vector.broadcast %cst_9 : f32 to vector<8x1xf32>
    %18 = arith.maximumf %16, %17 : vector<8x1xf32>
    %c0_10 = arith.constant 0 : index
    %c1 = arith.constant 1 : index
    %19 = vector.load %arg3[%c0_10, %c1] : memref<8x3xf32, #tpu.memory_space<vmem>>, vector<8x1xf32>
    %cst_11 = arith.constant 9.99999974E-6 : f32
    %20 = vector.broadcast %cst_11 : f32 to vector<8x1xf32>
    %21 = arith.addf %18, %20 : vector<8x1xf32>
    %22 = math.rsqrt %21 : vector<8x1xf32>
    %23 = arith.mulf %19, %22 : vector<8x1xf32>
    %24 = vector.broadcast %12 : vector<8x1xf32> to vector<8x128xf32>
    %25 = arith.subf %5, %24 : vector<8x128xf32>
    %26 = vector.broadcast %23 : vector<8x1xf32> to vector<8x128xf32>
    %27 = arith.mulf %25, %26 : vector<8x128xf32>
    %c0_12 = arith.constant 0 : index
    %c2 = arith.constant 2 : index
    %28 = vector.load %arg3[%c0_12, %c2] : memref<8x3xf32, #tpu.memory_space<vmem>>, vector<8x1xf32>
    %29 = vector.broadcast %28 : vector<8x1xf32> to vector<8x128xf32>
    %30 = arith.addf %27, %29 : vector<8x128xf32>
    %cst_13 = arith.constant 0.000000e+00 : f32
    %31 = vector.broadcast %cst_13 : f32 to vector<8x128xf32>
    %32 = arith.cmpf oge, %30, %31 : vector<8x128xf32>
    %cst_14 = arith.constant 0.00999999977 : f32
    %33 = vector.broadcast %cst_14 : f32 to vector<8x128xf32>
    %34 = arith.mulf %33, %30 : vector<8x128xf32>
    %35 = arith.select %32, %30, %34 : vector<8x128xi1>, vector<8x128xf32>
    %c0_15 = arith.constant 0 : index
    %c0_16 = arith.constant 0 : index
    %36 = vector.load %arg4[%c0_15, %c0_16] : memref<8x128xf32, #tpu.memory_space<vmem>>, vector<8x128xf32>
    tpu.vector_store %arg4[%c0_15, %c0_16], %35 {strides = array<i32>} : memref<8x128xf32, #tpu.memory_space<vmem>>, vector<8x128xf32>,
    return
  }
  func.func @transform_0(%arg0: i32) -> (i32, i32) {
    %c0_i32 = arith.constant 0 : i32
    %c0_i32_0 = arith.constant 0 : i32
    %c0_i32_1 = arith.constant 0 : i32
    return %c0_i32, %c0_i32_0 : i32, i32
  }
  func.func @transform_1(%arg0: i32) -> (i32, i32) {
    %c0_i32 = arith.constant 0 : i32
    %c0_i32_0 = arith.constant 0 : i32
    %c0_i32_1 = arith.constant 0 : i32
    return %c0_i32, %c0_i32_0 : i32, i32
  }
  func.func @transform_2(%arg0: i32) -> (i32, i32) {
    %c0_i32 = arith.constant 0 : i32
    %c0_i32_0 = arith.constant 0 : i32
    %c0_i32_1 = arith.constant 0 : i32
    return %c0_i32, %c0_i32_0 : i32, i32
  }
  func.func @transform_3(%arg0: i32) -> (i32, i32) {
    %c0_i32 = arith.constant 0 : i32
    %c0_i32_0 = arith.constant 0 : i32
    %c0_i32_1 = arith.constant 0 : i32
    return %c0_i32, %c0_i32_0 : i32, i32
  }
}

module attributes {stable_mosaic.version = 11 : i64} {
  func.func @_conv_kernel(%arg0: i32, %arg1: memref<32x72xf32, #tpu.memory_space<vmem>>, %arg2: memref<72x16xf32, #tpu.memory_space<vmem>>, %arg3: memref<3x16xf32, #tpu.memory_space<vmem>>, %arg4: memref<32x16xf32, #tpu.memory_space<vmem>>) attributes {dimension_semantics = [#tpu.dimension_semantics<arbitrary>], iteration_bounds = array<i64: 1>, scalar_prefetch = 0 : i64, scratch_operands = 0 : i64, tpu.core_type = #tpu.core_type<tc>, window_params = [{pipeline_mode = #tpu.pipeline_mode<synchronous>, transform_indices = @transform_0, window_bounds = array<i64: 32, 72>}, {pipeline_mode = #tpu.pipeline_mode<synchronous>, transform_indices = @transform_1, window_bounds = array<i64: 72, 16>}, {pipeline_mode = #tpu.pipeline_mode<synchronous>, transform_indices = @transform_2, window_bounds = array<i64: 3, 16>}, {pipeline_mode = #tpu.pipeline_mode<synchronous>, transform_indices = @transform_3, window_bounds = array<i64: 32, 16>}]} {
    %c0 = arith.constant 0 : index
    %c0_0 = arith.constant 0 : index
    %0 = vector.load %arg1[%c0, %c0_0] : memref<32x72xf32, #tpu.memory_space<vmem>>, vector<32x72xf32>
    %c0_1 = arith.constant 0 : index
    %c0_2 = arith.constant 0 : index
    %1 = vector.load %arg2[%c0_1, %c0_2] : memref<72x16xf32, #tpu.memory_space<vmem>>, vector<72x16xf32>
    %cst = arith.constant dense<0.000000e+00> : vector<32x16xf32>
    %2 = tpu.matmul %0, %1, %cst {dimension_numbers = #tpu.dot_dimension_numbers<[1], [0], [0], [1], [0, 0, 1, 1], [], []>} : vector<32x72xf32>, vector<72x16xf32>, vector<32x16xf32> -> vector<32x16xf32>
    %c0_3 = arith.constant 0 : index
    %c0_4 = arith.constant 0 : index
    %3 = vector.load %arg3[%c0_3, %c0_4] : memref<3x16xf32, #tpu.memory_space<vmem>>, vector<1x16xf32>
    %4 = vector.broadcast %3 : vector<1x16xf32> to vector<32x16xf32>
    %5 = arith.addf %2, %4 : vector<32x16xf32>
    %cst_5 = arith.constant dense<0.000000e+00> : vector<16xf32>
    %6 = vector.multi_reduction <add>, %5, %cst_5 [0] : vector<32x16xf32> to vector<16xf32>
    %7 = vector.shape_cast %6 : vector<16xf32> to vector<1x16xf32>
    %8 = arith.mulf %5, %5 : vector<32x16xf32>
    %cst_6 = arith.constant dense<0.000000e+00> : vector<16xf32>
    %9 = vector.multi_reduction <add>, %8, %cst_6 [0] : vector<32x16xf32> to vector<16xf32>
    %10 = vector.shape_cast %9 : vector<16xf32> to vector<1x16xf32>
    %cst_7 = arith.constant 3.125000e-02 : f32
    %11 = vector.broadcast %cst_7 : f32 to vector<1x16xf32>
    %12 = arith.mulf %7, %11 : vector<1x16xf32>
    %cst_8 = arith.constant 3.125000e-02 : f32
    %13 = vector.broadcast %cst_8 : f32 to vector<1x16xf32>
    %14 = arith.mulf %10, %13 : vector<1x16xf32>
    %15 = arith.mulf %12, %12 : vector<1x16xf32>
    %16 = arith.subf %14, %15 : vector<1x16xf32>
    %cst_9 = arith.constant 0.000000e+00 : f32
    %17 = vector.broadcast %cst_9 : f32 to vector<1x16xf32>
    %18 = arith.maximumf %16, %17 : vector<1x16xf32>
    %c1 = arith.constant 1 : index
    %c0_10 = arith.constant 0 : index
    %19 = vector.load %arg3[%c1, %c0_10] : memref<3x16xf32, #tpu.memory_space<vmem>>, vector<1x16xf32>
    %cst_11 = arith.constant 9.99999974E-6 : f32
    %20 = vector.broadcast %cst_11 : f32 to vector<1x16xf32>
    %21 = arith.addf %18, %20 : vector<1x16xf32>
    %22 = math.rsqrt %21 : vector<1x16xf32>
    %23 = arith.mulf %19, %22 : vector<1x16xf32>
    %24 = vector.broadcast %12 : vector<1x16xf32> to vector<32x16xf32>
    %25 = arith.subf %5, %24 : vector<32x16xf32>
    %26 = vector.broadcast %23 : vector<1x16xf32> to vector<32x16xf32>
    %27 = arith.mulf %25, %26 : vector<32x16xf32>
    %c2 = arith.constant 2 : index
    %c0_12 = arith.constant 0 : index
    %28 = vector.load %arg3[%c2, %c0_12] : memref<3x16xf32, #tpu.memory_space<vmem>>, vector<1x16xf32>
    %29 = vector.broadcast %28 : vector<1x16xf32> to vector<32x16xf32>
    %30 = arith.addf %27, %29 : vector<32x16xf32>
    %cst_13 = arith.constant 0.000000e+00 : f32
    %31 = vector.broadcast %cst_13 : f32 to vector<32x16xf32>
    %32 = arith.cmpf oge, %30, %31 : vector<32x16xf32>
    %cst_14 = arith.constant 0.00999999977 : f32
    %33 = vector.broadcast %cst_14 : f32 to vector<32x16xf32>
    %34 = arith.mulf %33, %30 : vector<32x16xf32>
    %35 = arith.select %32, %30, %34 : vector<32x16xi1>, vector<32x16xf32>
    %c0_15 = arith.constant 0 : index
    %c0_16 = arith.constant 0 : index
    %36 = vector.load %arg4[%c0_15, %c0_16] : memref<32x16xf32, #tpu.memory_space<vmem>>, vector<32x16xf32>
    tpu.vector_store %arg4[%c0_15, %c0_16], %35 {strides = array<i32>} : memref<32x16xf32, #tpu.memory_space<vmem>>, vector<32x16xf32>,
    return
  }
  func.func @transform_0(%arg0: i32) -> (i32, i32) {
    %c0_i32 = arith.constant 0 : i32
    %c0_i32_0 = arith.constant 0 : i32
    %c0_i32_1 = arith.constant 0 : i32
    return %c0_i32, %c0_i32_0 : i32, i32
  }
  func.func @transform_1(%arg0: i32) -> (i32, i32) {
    %c0_i32 = arith.constant 0 : i32
    %c0_i32_0 = arith.constant 0 : i32
    %c0_i32_1 = arith.constant 0 : i32
    return %c0_i32, %c0_i32_0 : i32, i32
  }
  func.func @transform_2(%arg0: i32) -> (i32, i32) {
    %c0_i32 = arith.constant 0 : i32
    %c0_i32_0 = arith.constant 0 : i32
    %c0_i32_1 = arith.constant 0 : i32
    return %c0_i32, %c0_i32_0 : i32, i32
  }
  func.func @transform_3(%arg0: i32) -> (i32, i32) {
    %c0_i32 = arith.constant 0 : i32
    %c0_i32_0 = arith.constant 0 : i32
    %c0_i32_1 = arith.constant 0 : i32
    return %c0_i32, %c0_i32_0 : i32, i32
  }
}

module attributes {stable_mosaic.version = 11 : i64} {
  func.func @_conv_kernel(%arg0: i32, %arg1: memref<8x144xf32, #tpu.memory_space<vmem>>, %arg2: memref<144x32xf32, #tpu.memory_space<vmem>>, %arg3: memref<3x32xf32, #tpu.memory_space<vmem>>, %arg4: memref<8x32xf32, #tpu.memory_space<vmem>>) attributes {dimension_semantics = [#tpu.dimension_semantics<arbitrary>], iteration_bounds = array<i64: 1>, scalar_prefetch = 0 : i64, scratch_operands = 0 : i64, tpu.core_type = #tpu.core_type<tc>, window_params = [{pipeline_mode = #tpu.pipeline_mode<synchronous>, transform_indices = @transform_0, window_bounds = array<i64: 8, 144>}, {pipeline_mode = #tpu.pipeline_mode<synchronous>, transform_indices = @transform_1, window_bounds = array<i64: 144, 32>}, {pipeline_mode = #tpu.pipeline_mode<synchronous>, transform_indices = @transform_2, window_bounds = array<i64: 3, 32>}, {pipeline_mode = #tpu.pipeline_mode<synchronous>, transform_indices = @transform_3, window_bounds = array<i64: 8, 32>}]} {
    %c0 = arith.constant 0 : index
    %c0_0 = arith.constant 0 : index
    %0 = vector.load %arg1[%c0, %c0_0] : memref<8x144xf32, #tpu.memory_space<vmem>>, vector<8x144xf32>
    %c0_1 = arith.constant 0 : index
    %c0_2 = arith.constant 0 : index
    %1 = vector.load %arg2[%c0_1, %c0_2] : memref<144x32xf32, #tpu.memory_space<vmem>>, vector<144x32xf32>
    %cst = arith.constant dense<0.000000e+00> : vector<8x32xf32>
    %2 = tpu.matmul %0, %1, %cst {dimension_numbers = #tpu.dot_dimension_numbers<[1], [0], [0], [1], [0, 0, 1, 1], [], []>} : vector<8x144xf32>, vector<144x32xf32>, vector<8x32xf32> -> vector<8x32xf32>
    %c0_3 = arith.constant 0 : index
    %c0_4 = arith.constant 0 : index
    %3 = vector.load %arg3[%c0_3, %c0_4] : memref<3x32xf32, #tpu.memory_space<vmem>>, vector<1x32xf32>
    %4 = vector.broadcast %3 : vector<1x32xf32> to vector<8x32xf32>
    %5 = arith.addf %2, %4 : vector<8x32xf32>
    %cst_5 = arith.constant dense<0.000000e+00> : vector<32xf32>
    %6 = vector.multi_reduction <add>, %5, %cst_5 [0] : vector<8x32xf32> to vector<32xf32>
    %7 = vector.shape_cast %6 : vector<32xf32> to vector<1x32xf32>
    %8 = arith.mulf %5, %5 : vector<8x32xf32>
    %cst_6 = arith.constant dense<0.000000e+00> : vector<32xf32>
    %9 = vector.multi_reduction <add>, %8, %cst_6 [0] : vector<8x32xf32> to vector<32xf32>
    %10 = vector.shape_cast %9 : vector<32xf32> to vector<1x32xf32>
    %cst_7 = arith.constant 1.250000e-01 : f32
    %11 = vector.broadcast %cst_7 : f32 to vector<1x32xf32>
    %12 = arith.mulf %7, %11 : vector<1x32xf32>
    %cst_8 = arith.constant 1.250000e-01 : f32
    %13 = vector.broadcast %cst_8 : f32 to vector<1x32xf32>
    %14 = arith.mulf %10, %13 : vector<1x32xf32>
    %15 = arith.mulf %12, %12 : vector<1x32xf32>
    %16 = arith.subf %14, %15 : vector<1x32xf32>
    %cst_9 = arith.constant 0.000000e+00 : f32
    %17 = vector.broadcast %cst_9 : f32 to vector<1x32xf32>
    %18 = arith.maximumf %16, %17 : vector<1x32xf32>
    %c1 = arith.constant 1 : index
    %c0_10 = arith.constant 0 : index
    %19 = vector.load %arg3[%c1, %c0_10] : memref<3x32xf32, #tpu.memory_space<vmem>>, vector<1x32xf32>
    %cst_11 = arith.constant 9.99999974E-6 : f32
    %20 = vector.broadcast %cst_11 : f32 to vector<1x32xf32>
    %21 = arith.addf %18, %20 : vector<1x32xf32>
    %22 = math.rsqrt %21 : vector<1x32xf32>
    %23 = arith.mulf %19, %22 : vector<1x32xf32>
    %24 = vector.broadcast %12 : vector<1x32xf32> to vector<8x32xf32>
    %25 = arith.subf %5, %24 : vector<8x32xf32>
    %26 = vector.broadcast %23 : vector<1x32xf32> to vector<8x32xf32>
    %27 = arith.mulf %25, %26 : vector<8x32xf32>
    %c2 = arith.constant 2 : index
    %c0_12 = arith.constant 0 : index
    %28 = vector.load %arg3[%c2, %c0_12] : memref<3x32xf32, #tpu.memory_space<vmem>>, vector<1x32xf32>
    %29 = vector.broadcast %28 : vector<1x32xf32> to vector<8x32xf32>
    %30 = arith.addf %27, %29 : vector<8x32xf32>
    %cst_13 = arith.constant 0.000000e+00 : f32
    %31 = vector.broadcast %cst_13 : f32 to vector<8x32xf32>
    %32 = arith.cmpf oge, %30, %31 : vector<8x32xf32>
    %cst_14 = arith.constant 0.00999999977 : f32
    %33 = vector.broadcast %cst_14 : f32 to vector<8x32xf32>
    %34 = arith.mulf %33, %30 : vector<8x32xf32>
    %35 = arith.select %32, %30, %34 : vector<8x32xi1>, vector<8x32xf32>
    %c0_15 = arith.constant 0 : index
    %c0_16 = arith.constant 0 : index
    %36 = vector.load %arg4[%c0_15, %c0_16] : memref<8x32xf32, #tpu.memory_space<vmem>>, vector<8x32xf32>
    tpu.vector_store %arg4[%c0_15, %c0_16], %35 {strides = array<i32>} : memref<8x32xf32, #tpu.memory_space<vmem>>, vector<8x32xf32>,
    return
  }
  func.func @transform_0(%arg0: i32) -> (i32, i32) {
    %c0_i32 = arith.constant 0 : i32
    %c0_i32_0 = arith.constant 0 : i32
    %c0_i32_1 = arith.constant 0 : i32
    return %c0_i32, %c0_i32_0 : i32, i32
  }
  func.func @transform_1(%arg0: i32) -> (i32, i32) {
    %c0_i32 = arith.constant 0 : i32
    %c0_i32_0 = arith.constant 0 : i32
    %c0_i32_1 = arith.constant 0 : i32
    return %c0_i32, %c0_i32_0 : i32, i32
  }
  func.func @transform_2(%arg0: i32) -> (i32, i32) {
    %c0_i32 = arith.constant 0 : i32
    %c0_i32_0 = arith.constant 0 : i32
    %c0_i32_1 = arith.constant 0 : i32
    return %c0_i32, %c0_i32_0 : i32, i32
  }
  func.func @transform_3(%arg0: i32) -> (i32, i32) {
    %c0_i32 = arith.constant 0 : i32
    %c0_i32_0 = arith.constant 0 : i32
    %c0_i32_1 = arith.constant 0 : i32
    return %c0_i32, %c0_i32_0 : i32, i32
  }
}

module attributes {stable_mosaic.version = 11 : i64} {
  func.func @_latent_kernel(%arg0: i32, %arg1: memref<2x128xf32, #tpu.memory_space<vmem>>, %arg2: memref<128x8xf32, #tpu.memory_space<vmem>>, %arg3: memref<128x8xf32, #tpu.memory_space<vmem>>, %arg4: memref<2x8xf32, #tpu.memory_space<vmem>>, %arg5: memref<2x8xf32, #tpu.memory_space<vmem>>, %arg6: memref<8x128xf32, #tpu.memory_space<vmem>>, %arg7: memref<1x128xf32, #tpu.memory_space<vmem>>, %arg8: memref<2x8xf32, #tpu.memory_space<vmem>>, %arg9: memref<2x8xf32, #tpu.memory_space<vmem>>, %arg10: memref<2x128xf32, #tpu.memory_space<vmem>>) attributes {dimension_semantics = [#tpu.dimension_semantics<arbitrary>], iteration_bounds = array<i64: 1>, scalar_prefetch = 0 : i64, scratch_operands = 0 : i64, tpu.core_type = #tpu.core_type<tc>, window_params = [{pipeline_mode = #tpu.pipeline_mode<synchronous>, transform_indices = @transform_0, window_bounds = array<i64: 2, 128>}, {pipeline_mode = #tpu.pipeline_mode<synchronous>, transform_indices = @transform_1, window_bounds = array<i64: 128, 8>}, {pipeline_mode = #tpu.pipeline_mode<synchronous>, transform_indices = @transform_2, window_bounds = array<i64: 128, 8>}, {pipeline_mode = #tpu.pipeline_mode<synchronous>, transform_indices = @transform_3, window_bounds = array<i64: 2, 8>}, {pipeline_mode = #tpu.pipeline_mode<synchronous>, transform_indices = @transform_4, window_bounds = array<i64: 2, 8>}, {pipeline_mode = #tpu.pipeline_mode<synchronous>, transform_indices = @transform_5, window_bounds = array<i64: 8, 128>}, {pipeline_mode = #tpu.pipeline_mode<synchronous>, transform_indices = @transform_6, window_bounds = array<i64: 1, 128>}, {pipeline_mode = #tpu.pipeline_mode<synchronous>, transform_indices = @transform_7, window_bounds = array<i64: 2, 8>}, {pipeline_mode = #tpu.pipeline_mode<synchronous>, transform_indices = @transform_8, window_bounds = array<i64: 2, 8>}, {pipeline_mode = #tpu.pipeline_mode<synchronous>, transform_indices = @transform_9, window_bounds = array<i64: 2, 128>}]} {
    %c0 = arith.constant 0 : index
    %c0_0 = arith.constant 0 : index
    %0 = vector.load %arg1[%c0, %c0_0] : memref<2x128xf32, #tpu.memory_space<vmem>>, vector<2x128xf32>
    %c0_1 = arith.constant 0 : index
    %c0_2 = arith.constant 0 : index
    %1 = vector.load %arg2[%c0_1, %c0_2] : memref<128x8xf32, #tpu.memory_space<vmem>>, vector<128x8xf32>
    %cst = arith.constant dense<0.000000e+00> : vector<2x8xf32>
    %2 = tpu.matmul %0, %1, %cst {dimension_numbers = #tpu.dot_dimension_numbers<[1], [0], [0], [1], [0, 0, 1, 1], [], []>} : vector<2x128xf32>, vector<128x8xf32>, vector<2x8xf32> -> vector<2x8xf32>
    %c0_3 = arith.constant 0 : index
    %c0_4 = arith.constant 0 : index
    %3 = vector.load %arg4[%c0_3, %c0_4] : memref<2x8xf32, #tpu.memory_space<vmem>>, vector<1x8xf32>
    %4 = vector.broadcast %3 : vector<1x8xf32> to vector<2x8xf32>
    %5 = arith.addf %2, %4 : vector<2x8xf32>
    %c0_5 = arith.constant 0 : index
    %c0_6 = arith.constant 0 : index
    %6 = vector.load %arg3[%c0_5, %c0_6] : memref<128x8xf32, #tpu.memory_space<vmem>>, vector<128x8xf32>
    %cst_7 = arith.constant dense<0.000000e+00> : vector<2x8xf32>
    %7 = tpu.matmul %0, %6, %cst_7 {dimension_numbers = #tpu.dot_dimension_numbers<[1], [0], [0], [1], [0, 0, 1, 1], [], []>} : vector<2x128xf32>, vector<128x8xf32>, vector<2x8xf32> -> vector<2x8xf32>
    %c1 = arith.constant 1 : index
    %c0_8 = arith.constant 0 : index
    %8 = vector.load %arg4[%c1, %c0_8] : memref<2x8xf32, #tpu.memory_space<vmem>>, vector<1x8xf32>
    %9 = vector.broadcast %8 : vector<1x8xf32> to vector<2x8xf32>
    %10 = arith.addf %7, %9 : vector<2x8xf32>
    %c0_9 = arith.constant 0 : index
    %c0_10 = arith.constant 0 : index
    %11 = vector.load %arg5[%c0_9, %c0_10] : memref<2x8xf32, #tpu.memory_space<vmem>>, vector<2x8xf32>
    %cst_11 = arith.constant 5.000000e-01 : f32
    %12 = vector.broadcast %cst_11 : f32 to vector<2x8xf32>
    %13 = arith.mulf %12, %10 : vector<2x8xf32>
    %14 = math.exp %13 : vector<2x8xf32>
    %15 = arith.mulf %11, %14 : vector<2x8xf32>
    %16 = arith.addf %15, %5 : vector<2x8xf32>
    %c0_12 = arith.constant 0 : index
    %c0_13 = arith.constant 0 : index
    %17 = vector.load %arg6[%c0_12, %c0_13] : memref<8x128xf32, #tpu.memory_space<vmem>>, vector<8x128xf32>
    %cst_14 = arith.constant dense<0.000000e+00> : vector<2x128xf32>
    %18 = tpu.matmul %16, %17, %cst_14 {dimension_numbers = #tpu.dot_dimension_numbers<[1], [0], [0], [1], [0, 0, 1, 1], [], []>} : vector<2x8xf32>, vector<8x128xf32>, vector<2x128xf32> -> vector<2x128xf32>
    %c0_15 = arith.constant 0 : index
    %c0_16 = arith.constant 0 : index
    %19 = vector.load %arg7[%c0_15, %c0_16] : memref<1x128xf32, #tpu.memory_space<vmem>>, vector<1x128xf32>
    %20 = vector.broadcast %19 : vector<1x128xf32> to vector<2x128xf32>
    %21 = arith.addf %18, %20 : vector<2x128xf32>
    %c0_17 = arith.constant 0 : index
    %c0_18 = arith.constant 0 : index
    %22 = vector.load %arg8[%c0_17, %c0_18] : memref<2x8xf32, #tpu.memory_space<vmem>>, vector<2x8xf32>
    tpu.vector_store %arg8[%c0_17, %c0_18], %5 {strides = array<i32>} : memref<2x8xf32, #tpu.memory_space<vmem>>, vector<2x8xf32>,
    %c0_19 = arith.constant 0 : index
    %c0_20 = arith.constant 0 : index
    %23 = vector.load %arg9[%c0_19, %c0_20] : memref<2x8xf32, #tpu.memory_space<vmem>>, vector<2x8xf32>
    tpu.vector_store %arg9[%c0_19, %c0_20], %10 {strides = array<i32>} : memref<2x8xf32, #tpu.memory_space<vmem>>, vector<2x8xf32>,
    %c0_21 = arith.constant 0 : index
    %c0_22 = arith.constant 0 : index
    %24 = vector.load %arg10[%c0_21, %c0_22] : memref<2x128xf32, #tpu.memory_space<vmem>>, vector<2x128xf32>
    tpu.vector_store %arg10[%c0_21, %c0_22], %21 {strides = array<i32>} : memref<2x128xf32, #tpu.memory_space<vmem>>, vector<2x128xf32>,
    return
  }
  func.func @transform_0(%arg0: i32) -> (i32, i32) {
    %c0_i32 = arith.constant 0 : i32
    %c0_i32_0 = arith.constant 0 : i32
    %c0_i32_1 = arith.constant 0 : i32
    return %c0_i32, %c0_i32_0 : i32, i32
  }
  func.func @transform_1(%arg0: i32) -> (i32, i32) {
    %c0_i32 = arith.constant 0 : i32
    %c0_i32_0 = arith.constant 0 : i32
    %c0_i32_1 = arith.constant 0 : i32
    return %c0_i32, %c0_i32_0 : i32, i32
  }
  func.func @transform_2(%arg0: i32) -> (i32, i32) {
    %c0_i32 = arith.constant 0 : i32
    %c0_i32_0 = arith.constant 0 : i32
    %c0_i32_1 = arith.constant 0 : i32
    return %c0_i32, %c0_i32_0 : i32, i32
  }
  func.func @transform_3(%arg0: i32) -> (i32, i32) {
    %c0_i32 = arith.constant 0 : i32
    %c0_i32_0 = arith.constant 0 : i32
    %c0_i32_1 = arith.constant 0 : i32
    return %c0_i32, %c0_i32_0 : i32, i32
  }
  func.func @transform_4(%arg0: i32) -> (i32, i32) {
    %c0_i32 = arith.constant 0 : i32
    %c0_i32_0 = arith.constant 0 : i32
    %c0_i32_1 = arith.constant 0 : i32
    return %c0_i32, %c0_i32_0 : i32, i32
  }
  func.func @transform_5(%arg0: i32) -> (i32, i32) {
    %c0_i32 = arith.constant 0 : i32
    %c0_i32_0 = arith.constant 0 : i32
    %c0_i32_1 = arith.constant 0 : i32
    return %c0_i32, %c0_i32_0 : i32, i32
  }
  func.func @transform_6(%arg0: i32) -> (i32, i32) {
    %c0_i32 = arith.constant 0 : i32
    %c0_i32_0 = arith.constant 0 : i32
    %c0_i32_1 = arith.constant 0 : i32
    return %c0_i32, %c0_i32_0 : i32, i32
  }
  func.func @transform_7(%arg0: i32) -> (i32, i32) {
    %c0_i32 = arith.constant 0 : i32
    %c0_i32_0 = arith.constant 0 : i32
    %c0_i32_1 = arith.constant 0 : i32
    return %c0_i32, %c0_i32_0 : i32, i32
  }
  func.func @transform_8(%arg0: i32) -> (i32, i32) {
    %c0_i32 = arith.constant 0 : i32
    %c0_i32_0 = arith.constant 0 : i32
    %c0_i32_1 = arith.constant 0 : i32
    return %c0_i32, %c0_i32_0 : i32, i32
  }
  func.func @transform_9(%arg0: i32) -> (i32, i32) {
    %c0_i32 = arith.constant 0 : i32
    %c0_i32_0 = arith.constant 0 : i32
    %c0_i32_1 = arith.constant 0 : i32
    return %c0_i32, %c0_i32_0 : i32, i32
  }
}

module attributes {stable_mosaic.version = 11 : i64} {
  func.func @_ct_kernel(%arg0: i32, %arg1: memref<128x8xf32, #tpu.memory_space<vmem>>, %arg2: memref<64x128xf32, #tpu.memory_space<vmem>>, %arg3: memref<64x3xf32, #tpu.memory_space<vmem>>, %arg4: memref<64x8xf32, #tpu.memory_space<vmem>>) attributes {dimension_semantics = [#tpu.dimension_semantics<arbitrary>], iteration_bounds = array<i64: 1>, scalar_prefetch = 0 : i64, scratch_operands = 0 : i64, tpu.core_type = #tpu.core_type<tc>, window_params = [{pipeline_mode = #tpu.pipeline_mode<synchronous>, transform_indices = @transform_0, window_bounds = array<i64: 128, 8>}, {pipeline_mode = #tpu.pipeline_mode<synchronous>, transform_indices = @transform_1, window_bounds = array<i64: 64, 128>}, {pipeline_mode = #tpu.pipeline_mode<synchronous>, transform_indices = @transform_2, window_bounds = array<i64: 64, 3>}, {pipeline_mode = #tpu.pipeline_mode<synchronous>, transform_indices = @transform_3, window_bounds = array<i64: 64, 8>}]} {
    %c0 = arith.constant 0 : index
    %c0_0 = arith.constant 0 : index
    %0 = vector.load %arg2[%c0, %c0_0] : memref<64x128xf32, #tpu.memory_space<vmem>>, vector<64x128xf32>
    %c0_1 = arith.constant 0 : index
    %c0_2 = arith.constant 0 : index
    %1 = vector.load %arg1[%c0_1, %c0_2] : memref<128x8xf32, #tpu.memory_space<vmem>>, vector<128x8xf32>
    %cst = arith.constant dense<0.000000e+00> : vector<64x8xf32>
    %2 = tpu.matmul %0, %1, %cst {dimension_numbers = #tpu.dot_dimension_numbers<[1], [0], [0], [1], [0, 0, 1, 1], [], []>} : vector<64x128xf32>, vector<128x8xf32>, vector<64x8xf32> -> vector<64x8xf32>
    %c0_3 = arith.constant 0 : index
    %c0_4 = arith.constant 0 : index
    %3 = vector.load %arg3[%c0_3, %c0_4] : memref<64x3xf32, #tpu.memory_space<vmem>>, vector<64x1xf32>
    %4 = vector.broadcast %3 : vector<64x1xf32> to vector<64x8xf32>
    %5 = arith.addf %2, %4 : vector<64x8xf32>
    %cst_5 = arith.constant dense<0.000000e+00> : vector<64xf32>
    %6 = vector.multi_reduction <add>, %5, %cst_5 [1] : vector<64x8xf32> to vector<64xf32>
    %7 = vector.shape_cast %6 : vector<64xf32> to vector<64x1xf32>
    %8 = arith.mulf %5, %5 : vector<64x8xf32>
    %cst_6 = arith.constant dense<0.000000e+00> : vector<64xf32>
    %9 = vector.multi_reduction <add>, %8, %cst_6 [1] : vector<64x8xf32> to vector<64xf32>
    %10 = vector.shape_cast %9 : vector<64xf32> to vector<64x1xf32>
    %11 = vector.extract_strided_slice %7 {offsets = [0, 0], sizes = [16, 1], strides = [1, 1]} : vector<64x1xf32> to vector<16x1xf32>
    %12 = vector.extract_strided_slice %7 {offsets = [16, 0], sizes = [16, 1], strides = [1, 1]} : vector<64x1xf32> to vector<16x1xf32>
    %13 = arith.addf %11, %12 : vector<16x1xf32>
    %14 = vector.extract_strided_slice %7 {offsets = [32, 0], sizes = [16, 1], strides = [1, 1]} : vector<64x1xf32> to vector<16x1xf32>
    %15 = arith.addf %13, %14 : vector<16x1xf32>
    %16 = vector.extract_strided_slice %7 {offsets = [48, 0], sizes = [16, 1], strides = [1, 1]} : vector<64x1xf32> to vector<16x1xf32>
    %17 = arith.addf %15, %16 : vector<16x1xf32>
    %18 = vector.extract_strided_slice %10 {offsets = [0, 0], sizes = [16, 1], strides = [1, 1]} : vector<64x1xf32> to vector<16x1xf32>
    %19 = vector.extract_strided_slice %10 {offsets = [16, 0], sizes = [16, 1], strides = [1, 1]} : vector<64x1xf32> to vector<16x1xf32>
    %20 = arith.addf %18, %19 : vector<16x1xf32>
    %21 = vector.extract_strided_slice %10 {offsets = [32, 0], sizes = [16, 1], strides = [1, 1]} : vector<64x1xf32> to vector<16x1xf32>
    %22 = arith.addf %20, %21 : vector<16x1xf32>
    %23 = vector.extract_strided_slice %10 {offsets = [48, 0], sizes = [16, 1], strides = [1, 1]} : vector<64x1xf32> to vector<16x1xf32>
    %24 = arith.addf %22, %23 : vector<16x1xf32>
    %cst_7 = arith.constant 3.125000e-02 : f32
    %25 = vector.broadcast %cst_7 : f32 to vector<16x1xf32>
    %26 = arith.mulf %17, %25 : vector<16x1xf32>
    %cst_8 = arith.constant 3.125000e-02 : f32
    %27 = vector.broadcast %cst_8 : f32 to vector<16x1xf32>
    %28 = arith.mulf %24, %27 : vector<16x1xf32>
    %29 = arith.mulf %26, %26 : vector<16x1xf32>
    %30 = arith.subf %28, %29 : vector<16x1xf32>
    %cst_9 = arith.constant 0.000000e+00 : f32
    %31 = vector.broadcast %cst_9 : f32 to vector<16x1xf32>
    %32 = arith.maximumf %30, %31 : vector<16x1xf32>
    %cst_10 = arith.constant 9.99999974E-6 : f32
    %33 = vector.broadcast %cst_10 : f32 to vector<16x1xf32>
    %34 = arith.addf %32, %33 : vector<16x1xf32>
    %35 = math.rsqrt %34 : vector<16x1xf32>
    %36 = tpu.concatenate %26, %26, %26, %26 in 0 : vector<16x1xf32>, vector<16x1xf32>, vector<16x1xf32>, vector<16x1xf32> -> vector<64x1xf32>
    %37 = tpu.concatenate %35, %35, %35, %35 in 0 : vector<16x1xf32>, vector<16x1xf32>, vector<16x1xf32>, vector<16x1xf32> -> vector<64x1xf32>
    %c0_11 = arith.constant 0 : index
    %c1 = arith.constant 1 : index
    %38 = vector.load %arg3[%c0_11, %c1] : memref<64x3xf32, #tpu.memory_space<vmem>>, vector<64x1xf32>
    %39 = arith.mulf %38, %37 : vector<64x1xf32>
    %40 = vector.broadcast %36 : vector<64x1xf32> to vector<64x8xf32>
    %41 = arith.subf %5, %40 : vector<64x8xf32>
    %42 = vector.broadcast %39 : vector<64x1xf32> to vector<64x8xf32>
    %43 = arith.mulf %41, %42 : vector<64x8xf32>
    %c0_12 = arith.constant 0 : index
    %c2 = arith.constant 2 : index
    %44 = vector.load %arg3[%c0_12, %c2] : memref<64x3xf32, #tpu.memory_space<vmem>>, vector<64x1xf32>
    %45 = vector.broadcast %44 : vector<64x1xf32> to vector<64x8xf32>
    %46 = arith.addf %43, %45 : vector<64x8xf32>
    %cst_13 = arith.constant 0.000000e+00 : f32
    %47 = vector.broadcast %cst_13 : f32 to vector<64x8xf32>
    %48 = arith.cmpf oge, %46, %47 : vector<64x8xf32>
    %cst_14 = arith.constant 0.00999999977 : f32
    %49 = vector.broadcast %cst_14 : f32 to vector<64x8xf32>
    %50 = arith.mulf %49, %46 : vector<64x8xf32>
    %51 = arith.select %48, %46, %50 : vector<64x8xi1>, vector<64x8xf32>
    %c0_15 = arith.constant 0 : index
    %c0_16 = arith.constant 0 : index
    %52 = vector.load %arg4[%c0_15, %c0_16] : memref<64x8xf32, #tpu.memory_space<vmem>>, vector<64x8xf32>
    tpu.vector_store %arg4[%c0_15, %c0_16], %51 {strides = array<i32>} : memref<64x8xf32, #tpu.memory_space<vmem>>, vector<64x8xf32>,
    return
  }
  func.func @transform_0(%arg0: i32) -> (i32, i32) {
    %c0_i32 = arith.constant 0 : i32
    %c0_i32_0 = arith.constant 0 : i32
    %c0_i32_1 = arith.constant 0 : i32
    return %c0_i32, %c0_i32_0 : i32, i32
  }
  func.func @transform_1(%arg0: i32) -> (i32, i32) {
    %c0_i32 = arith.constant 0 : i32
    %c0_i32_0 = arith.constant 0 : i32
    %c0_i32_1 = arith.constant 0 : i32
    return %c0_i32, %c0_i32_0 : i32, i32
  }
  func.func @transform_2(%arg0: i32) -> (i32, i32) {
    %c0_i32 = arith.constant 0 : i32
    %c0_i32_0 = arith.constant 0 : i32
    %c0_i32_1 = arith.constant 0 : i32
    return %c0_i32, %c0_i32_0 : i32, i32
  }
  func.func @transform_3(%arg0: i32) -> (i32, i32) {
    %c0_i32 = arith.constant 0 : i32
    %c0_i32_0 = arith.constant 0 : i32
    %c0_i32_1 = arith.constant 0 : i32
    return %c0_i32, %c0_i32_0 : i32, i32
  }
}

module attributes {stable_mosaic.version = 11 : i64} {
  func.func @_ct_kernel(%arg0: i32, %arg1: memref<64x32xf32, #tpu.memory_space<vmem>>, %arg2: memref<32x64xf32, #tpu.memory_space<vmem>>, %arg3: memref<32x3xf32, #tpu.memory_space<vmem>>, %arg4: memref<32x32xf32, #tpu.memory_space<vmem>>) attributes {dimension_semantics = [#tpu.dimension_semantics<arbitrary>], iteration_bounds = array<i64: 1>, scalar_prefetch = 0 : i64, scratch_operands = 0 : i64, tpu.core_type = #tpu.core_type<tc>, window_params = [{pipeline_mode = #tpu.pipeline_mode<synchronous>, transform_indices = @transform_0, window_bounds = array<i64: 64, 32>}, {pipeline_mode = #tpu.pipeline_mode<synchronous>, transform_indices = @transform_1, window_bounds = array<i64: 32, 64>}, {pipeline_mode = #tpu.pipeline_mode<synchronous>, transform_indices = @transform_2, window_bounds = array<i64: 32, 3>}, {pipeline_mode = #tpu.pipeline_mode<synchronous>, transform_indices = @transform_3, window_bounds = array<i64: 32, 32>}]} {
    %c0 = arith.constant 0 : index
    %c0_0 = arith.constant 0 : index
    %0 = vector.load %arg2[%c0, %c0_0] : memref<32x64xf32, #tpu.memory_space<vmem>>, vector<32x64xf32>
    %c0_1 = arith.constant 0 : index
    %c0_2 = arith.constant 0 : index
    %1 = vector.load %arg1[%c0_1, %c0_2] : memref<64x32xf32, #tpu.memory_space<vmem>>, vector<64x32xf32>
    %cst = arith.constant dense<0.000000e+00> : vector<32x32xf32>
    %2 = tpu.matmul %0, %1, %cst {dimension_numbers = #tpu.dot_dimension_numbers<[1], [0], [0], [1], [0, 0, 1, 1], [], []>} : vector<32x64xf32>, vector<64x32xf32>, vector<32x32xf32> -> vector<32x32xf32>
    %c0_3 = arith.constant 0 : index
    %c0_4 = arith.constant 0 : index
    %3 = vector.load %arg3[%c0_3, %c0_4] : memref<32x3xf32, #tpu.memory_space<vmem>>, vector<32x1xf32>
    %4 = vector.broadcast %3 : vector<32x1xf32> to vector<32x32xf32>
    %5 = arith.addf %2, %4 : vector<32x32xf32>
    %cst_5 = arith.constant dense<0.000000e+00> : vector<32xf32>
    %6 = vector.multi_reduction <add>, %5, %cst_5 [1] : vector<32x32xf32> to vector<32xf32>
    %7 = vector.shape_cast %6 : vector<32xf32> to vector<32x1xf32>
    %8 = arith.mulf %5, %5 : vector<32x32xf32>
    %cst_6 = arith.constant dense<0.000000e+00> : vector<32xf32>
    %9 = vector.multi_reduction <add>, %8, %cst_6 [1] : vector<32x32xf32> to vector<32xf32>
    %10 = vector.shape_cast %9 : vector<32xf32> to vector<32x1xf32>
    %11 = vector.extract_strided_slice %7 {offsets = [0, 0], sizes = [8, 1], strides = [1, 1]} : vector<32x1xf32> to vector<8x1xf32>
    %12 = vector.extract_strided_slice %7 {offsets = [8, 0], sizes = [8, 1], strides = [1, 1]} : vector<32x1xf32> to vector<8x1xf32>
    %13 = arith.addf %11, %12 : vector<8x1xf32>
    %14 = vector.extract_strided_slice %7 {offsets = [16, 0], sizes = [8, 1], strides = [1, 1]} : vector<32x1xf32> to vector<8x1xf32>
    %15 = arith.addf %13, %14 : vector<8x1xf32>
    %16 = vector.extract_strided_slice %7 {offsets = [24, 0], sizes = [8, 1], strides = [1, 1]} : vector<32x1xf32> to vector<8x1xf32>
    %17 = arith.addf %15, %16 : vector<8x1xf32>
    %18 = vector.extract_strided_slice %10 {offsets = [0, 0], sizes = [8, 1], strides = [1, 1]} : vector<32x1xf32> to vector<8x1xf32>
    %19 = vector.extract_strided_slice %10 {offsets = [8, 0], sizes = [8, 1], strides = [1, 1]} : vector<32x1xf32> to vector<8x1xf32>
    %20 = arith.addf %18, %19 : vector<8x1xf32>
    %21 = vector.extract_strided_slice %10 {offsets = [16, 0], sizes = [8, 1], strides = [1, 1]} : vector<32x1xf32> to vector<8x1xf32>
    %22 = arith.addf %20, %21 : vector<8x1xf32>
    %23 = vector.extract_strided_slice %10 {offsets = [24, 0], sizes = [8, 1], strides = [1, 1]} : vector<32x1xf32> to vector<8x1xf32>
    %24 = arith.addf %22, %23 : vector<8x1xf32>
    %cst_7 = arith.constant 7.812500e-03 : f32
    %25 = vector.broadcast %cst_7 : f32 to vector<8x1xf32>
    %26 = arith.mulf %17, %25 : vector<8x1xf32>
    %cst_8 = arith.constant 7.812500e-03 : f32
    %27 = vector.broadcast %cst_8 : f32 to vector<8x1xf32>
    %28 = arith.mulf %24, %27 : vector<8x1xf32>
    %29 = arith.mulf %26, %26 : vector<8x1xf32>
    %30 = arith.subf %28, %29 : vector<8x1xf32>
    %cst_9 = arith.constant 0.000000e+00 : f32
    %31 = vector.broadcast %cst_9 : f32 to vector<8x1xf32>
    %32 = arith.maximumf %30, %31 : vector<8x1xf32>
    %cst_10 = arith.constant 9.99999974E-6 : f32
    %33 = vector.broadcast %cst_10 : f32 to vector<8x1xf32>
    %34 = arith.addf %32, %33 : vector<8x1xf32>
    %35 = math.rsqrt %34 : vector<8x1xf32>
    %36 = tpu.concatenate %26, %26, %26, %26 in 0 : vector<8x1xf32>, vector<8x1xf32>, vector<8x1xf32>, vector<8x1xf32> -> vector<32x1xf32>
    %37 = tpu.concatenate %35, %35, %35, %35 in 0 : vector<8x1xf32>, vector<8x1xf32>, vector<8x1xf32>, vector<8x1xf32> -> vector<32x1xf32>
    %c0_11 = arith.constant 0 : index
    %c1 = arith.constant 1 : index
    %38 = vector.load %arg3[%c0_11, %c1] : memref<32x3xf32, #tpu.memory_space<vmem>>, vector<32x1xf32>
    %39 = arith.mulf %38, %37 : vector<32x1xf32>
    %40 = vector.broadcast %36 : vector<32x1xf32> to vector<32x32xf32>
    %41 = arith.subf %5, %40 : vector<32x32xf32>
    %42 = vector.broadcast %39 : vector<32x1xf32> to vector<32x32xf32>
    %43 = arith.mulf %41, %42 : vector<32x32xf32>
    %c0_12 = arith.constant 0 : index
    %c2 = arith.constant 2 : index
    %44 = vector.load %arg3[%c0_12, %c2] : memref<32x3xf32, #tpu.memory_space<vmem>>, vector<32x1xf32>
    %45 = vector.broadcast %44 : vector<32x1xf32> to vector<32x32xf32>
    %46 = arith.addf %43, %45 : vector<32x32xf32>
    %cst_13 = arith.constant 0.000000e+00 : f32
    %47 = vector.broadcast %cst_13 : f32 to vector<32x32xf32>
    %48 = arith.cmpf oge, %46, %47 : vector<32x32xf32>
    %cst_14 = arith.constant 0.00999999977 : f32
    %49 = vector.broadcast %cst_14 : f32 to vector<32x32xf32>
    %50 = arith.mulf %49, %46 : vector<32x32xf32>
    %51 = arith.select %48, %46, %50 : vector<32x32xi1>, vector<32x32xf32>
    %c0_15 = arith.constant 0 : index
    %c0_16 = arith.constant 0 : index
    %52 = vector.load %arg4[%c0_15, %c0_16] : memref<32x32xf32, #tpu.memory_space<vmem>>, vector<32x32xf32>
    tpu.vector_store %arg4[%c0_15, %c0_16], %51 {strides = array<i32>} : memref<32x32xf32, #tpu.memory_space<vmem>>, vector<32x32xf32>,
    return
  }
  func.func @transform_0(%arg0: i32) -> (i32, i32) {
    %c0_i32 = arith.constant 0 : i32
    %c0_i32_0 = arith.constant 0 : i32
    %c0_i32_1 = arith.constant 0 : i32
    return %c0_i32, %c0_i32_0 : i32, i32
  }
  func.func @transform_1(%arg0: i32) -> (i32, i32) {
    %c0_i32 = arith.constant 0 : i32
    %c0_i32_0 = arith.constant 0 : i32
    %c0_i32_1 = arith.constant 0 : i32
    return %c0_i32, %c0_i32_0 : i32, i32
  }
  func.func @transform_2(%arg0: i32) -> (i32, i32) {
    %c0_i32 = arith.constant 0 : i32
    %c0_i32_0 = arith.constant 0 : i32
    %c0_i32_1 = arith.constant 0 : i32
    return %c0_i32, %c0_i32_0 : i32, i32
  }
  func.func @transform_3(%arg0: i32) -> (i32, i32) {
    %c0_i32 = arith.constant 0 : i32
    %c0_i32_0 = arith.constant 0 : i32
    %c0_i32_1 = arith.constant 0 : i32
    return %c0_i32, %c0_i32_0 : i32, i32
  }
}

module attributes {stable_mosaic.version = 11 : i64} {
  func.func @_ct_kernel(%arg0: i32, %arg1: memref<32x128xf32, #tpu.memory_space<vmem>>, %arg2: memref<32x32xf32, #tpu.memory_space<vmem>>, %arg3: memref<32x3xf32, #tpu.memory_space<vmem>>, %arg4: memref<32x128xf32, #tpu.memory_space<vmem>>) attributes {dimension_semantics = [#tpu.dimension_semantics<arbitrary>], iteration_bounds = array<i64: 1>, scalar_prefetch = 0 : i64, scratch_operands = 0 : i64, tpu.core_type = #tpu.core_type<tc>, window_params = [{pipeline_mode = #tpu.pipeline_mode<synchronous>, transform_indices = @transform_0, window_bounds = array<i64: 32, 128>}, {pipeline_mode = #tpu.pipeline_mode<synchronous>, transform_indices = @transform_1, window_bounds = array<i64: 32, 32>}, {pipeline_mode = #tpu.pipeline_mode<synchronous>, transform_indices = @transform_2, window_bounds = array<i64: 32, 3>}, {pipeline_mode = #tpu.pipeline_mode<synchronous>, transform_indices = @transform_3, window_bounds = array<i64: 32, 128>}]} {
    %c0 = arith.constant 0 : index
    %c0_0 = arith.constant 0 : index
    %0 = vector.load %arg2[%c0, %c0_0] : memref<32x32xf32, #tpu.memory_space<vmem>>, vector<32x32xf32>
    %c0_1 = arith.constant 0 : index
    %c0_2 = arith.constant 0 : index
    %1 = vector.load %arg1[%c0_1, %c0_2] : memref<32x128xf32, #tpu.memory_space<vmem>>, vector<32x128xf32>
    %cst = arith.constant dense<0.000000e+00> : vector<32x128xf32>
    %2 = tpu.matmul %0, %1, %cst {dimension_numbers = #tpu.dot_dimension_numbers<[1], [0], [0], [1], [0, 0, 1, 1], [], []>} : vector<32x32xf32>, vector<32x128xf32>, vector<32x128xf32> -> vector<32x128xf32>
    %c0_3 = arith.constant 0 : index
    %c0_4 = arith.constant 0 : index
    %3 = vector.load %arg3[%c0_3, %c0_4] : memref<32x3xf32, #tpu.memory_space<vmem>>, vector<32x1xf32>
    %4 = vector.broadcast %3 : vector<32x1xf32> to vector<32x128xf32>
    %5 = arith.addf %2, %4 : vector<32x128xf32>
    %cst_5 = arith.constant dense<0.000000e+00> : vector<32xf32>
    %6 = vector.multi_reduction <add>, %5, %cst_5 [1] : vector<32x128xf32> to vector<32xf32>
    %7 = vector.shape_cast %6 : vector<32xf32> to vector<32x1xf32>
    %8 = arith.mulf %5, %5 : vector<32x128xf32>
    %cst_6 = arith.constant dense<0.000000e+00> : vector<32xf32>
    %9 = vector.multi_reduction <add>, %8, %cst_6 [1] : vector<32x128xf32> to vector<32xf32>
    %10 = vector.shape_cast %9 : vector<32xf32> to vector<32x1xf32>
    %11 = vector.extract_strided_slice %7 {offsets = [0, 0], sizes = [8, 1], strides = [1, 1]} : vector<32x1xf32> to vector<8x1xf32>
    %12 = vector.extract_strided_slice %7 {offsets = [8, 0], sizes = [8, 1], strides = [1, 1]} : vector<32x1xf32> to vector<8x1xf32>
    %13 = arith.addf %11, %12 : vector<8x1xf32>
    %14 = vector.extract_strided_slice %7 {offsets = [16, 0], sizes = [8, 1], strides = [1, 1]} : vector<32x1xf32> to vector<8x1xf32>
    %15 = arith.addf %13, %14 : vector<8x1xf32>
    %16 = vector.extract_strided_slice %7 {offsets = [24, 0], sizes = [8, 1], strides = [1, 1]} : vector<32x1xf32> to vector<8x1xf32>
    %17 = arith.addf %15, %16 : vector<8x1xf32>
    %18 = vector.extract_strided_slice %10 {offsets = [0, 0], sizes = [8, 1], strides = [1, 1]} : vector<32x1xf32> to vector<8x1xf32>
    %19 = vector.extract_strided_slice %10 {offsets = [8, 0], sizes = [8, 1], strides = [1, 1]} : vector<32x1xf32> to vector<8x1xf32>
    %20 = arith.addf %18, %19 : vector<8x1xf32>
    %21 = vector.extract_strided_slice %10 {offsets = [16, 0], sizes = [8, 1], strides = [1, 1]} : vector<32x1xf32> to vector<8x1xf32>
    %22 = arith.addf %20, %21 : vector<8x1xf32>
    %23 = vector.extract_strided_slice %10 {offsets = [24, 0], sizes = [8, 1], strides = [1, 1]} : vector<32x1xf32> to vector<8x1xf32>
    %24 = arith.addf %22, %23 : vector<8x1xf32>
    %cst_7 = arith.constant 0.001953125 : f32
    %25 = vector.broadcast %cst_7 : f32 to vector<8x1xf32>
    %26 = arith.mulf %17, %25 : vector<8x1xf32>
    %cst_8 = arith.constant 0.001953125 : f32
    %27 = vector.broadcast %cst_8 : f32 to vector<8x1xf32>
    %28 = arith.mulf %24, %27 : vector<8x1xf32>
    %29 = arith.mulf %26, %26 : vector<8x1xf32>
    %30 = arith.subf %28, %29 : vector<8x1xf32>
    %cst_9 = arith.constant 0.000000e+00 : f32
    %31 = vector.broadcast %cst_9 : f32 to vector<8x1xf32>
    %32 = arith.maximumf %30, %31 : vector<8x1xf32>
    %cst_10 = arith.constant 9.99999974E-6 : f32
    %33 = vector.broadcast %cst_10 : f32 to vector<8x1xf32>
    %34 = arith.addf %32, %33 : vector<8x1xf32>
    %35 = math.rsqrt %34 : vector<8x1xf32>
    %36 = tpu.concatenate %26, %26, %26, %26 in 0 : vector<8x1xf32>, vector<8x1xf32>, vector<8x1xf32>, vector<8x1xf32> -> vector<32x1xf32>
    %37 = tpu.concatenate %35, %35, %35, %35 in 0 : vector<8x1xf32>, vector<8x1xf32>, vector<8x1xf32>, vector<8x1xf32> -> vector<32x1xf32>
    %c0_11 = arith.constant 0 : index
    %c1 = arith.constant 1 : index
    %38 = vector.load %arg3[%c0_11, %c1] : memref<32x3xf32, #tpu.memory_space<vmem>>, vector<32x1xf32>
    %39 = arith.mulf %38, %37 : vector<32x1xf32>
    %40 = vector.broadcast %36 : vector<32x1xf32> to vector<32x128xf32>
    %41 = arith.subf %5, %40 : vector<32x128xf32>
    %42 = vector.broadcast %39 : vector<32x1xf32> to vector<32x128xf32>
    %43 = arith.mulf %41, %42 : vector<32x128xf32>
    %c0_12 = arith.constant 0 : index
    %c2 = arith.constant 2 : index
    %44 = vector.load %arg3[%c0_12, %c2] : memref<32x3xf32, #tpu.memory_space<vmem>>, vector<32x1xf32>
    %45 = vector.broadcast %44 : vector<32x1xf32> to vector<32x128xf32>
    %46 = arith.addf %43, %45 : vector<32x128xf32>
    %cst_13 = arith.constant 0.000000e+00 : f32
    %47 = vector.broadcast %cst_13 : f32 to vector<32x128xf32>
    %48 = arith.cmpf oge, %46, %47 : vector<32x128xf32>
    %cst_14 = arith.constant 0.00999999977 : f32
    %49 = vector.broadcast %cst_14 : f32 to vector<32x128xf32>
    %50 = arith.mulf %49, %46 : vector<32x128xf32>
    %51 = arith.select %48, %46, %50 : vector<32x128xi1>, vector<32x128xf32>
    %c0_15 = arith.constant 0 : index
    %c0_16 = arith.constant 0 : index
    %52 = vector.load %arg4[%c0_15, %c0_16] : memref<32x128xf32, #tpu.memory_space<vmem>>, vector<32x128xf32>
    tpu.vector_store %arg4[%c0_15, %c0_16], %51 {strides = array<i32>} : memref<32x128xf32, #tpu.memory_space<vmem>>, vector<32x128xf32>,
    return
  }
  func.func @transform_0(%arg0: i32) -> (i32, i32) {
    %c0_i32 = arith.constant 0 : i32
    %c0_i32_0 = arith.constant 0 : i32
    %c0_i32_1 = arith.constant 0 : i32
    return %c0_i32, %c0_i32_0 : i32, i32
  }
  func.func @transform_1(%arg0: i32) -> (i32, i32) {
    %c0_i32 = arith.constant 0 : i32
    %c0_i32_0 = arith.constant 0 : i32
    %c0_i32_1 = arith.constant 0 : i32
    return %c0_i32, %c0_i32_0 : i32, i32
  }
  func.func @transform_2(%arg0: i32) -> (i32, i32) {
    %c0_i32 = arith.constant 0 : i32
    %c0_i32_0 = arith.constant 0 : i32
    %c0_i32_1 = arith.constant 0 : i32
    return %c0_i32, %c0_i32_0 : i32, i32
  }
  func.func @transform_3(%arg0: i32) -> (i32, i32) {
    %c0_i32 = arith.constant 0 : i32
    %c0_i32_0 = arith.constant 0 : i32
    %c0_i32_1 = arith.constant 0 : i32
    return %c0_i32, %c0_i32_0 : i32, i32
  }
}

module attributes {stable_mosaic.version = 11 : i64} {
  func.func @_conv_kernel(%arg0: i32, %arg1: memref<72x512xf32, #tpu.memory_space<vmem>>, %arg2: memref<4x72xf32, #tpu.memory_space<vmem>>, %arg3: memref<4x1xf32, #tpu.memory_space<vmem>>, %arg4: memref<4x512xf32, #tpu.memory_space<vmem>>) attributes {dimension_semantics = [#tpu.dimension_semantics<arbitrary>], iteration_bounds = array<i64: 1>, scalar_prefetch = 0 : i64, scratch_operands = 0 : i64, tpu.core_type = #tpu.core_type<tc>, window_params = [{pipeline_mode = #tpu.pipeline_mode<synchronous>, transform_indices = @transform_0, window_bounds = array<i64: 72, 512>}, {pipeline_mode = #tpu.pipeline_mode<synchronous>, transform_indices = @transform_1, window_bounds = array<i64: 4, 72>}, {pipeline_mode = #tpu.pipeline_mode<synchronous>, transform_indices = @transform_2, window_bounds = array<i64: 4, 1>}, {pipeline_mode = #tpu.pipeline_mode<synchronous>, transform_indices = @transform_3, window_bounds = array<i64: 4, 512>}]} {
    %c0 = arith.constant 0 : index
    %c0_0 = arith.constant 0 : index
    %0 = vector.load %arg2[%c0, %c0_0] : memref<4x72xf32, #tpu.memory_space<vmem>>, vector<4x72xf32>
    %c0_1 = arith.constant 0 : index
    %c0_2 = arith.constant 0 : index
    %1 = vector.load %arg1[%c0_1, %c0_2] : memref<72x512xf32, #tpu.memory_space<vmem>>, vector<72x512xf32>
    %cst = arith.constant dense<0.000000e+00> : vector<4x512xf32>
    %2 = tpu.matmul %0, %1, %cst {dimension_numbers = #tpu.dot_dimension_numbers<[1], [0], [0], [1], [0, 0, 1, 1], [], []>} : vector<4x72xf32>, vector<72x512xf32>, vector<4x512xf32> -> vector<4x512xf32>
    %c0_3 = arith.constant 0 : index
    %c0_4 = arith.constant 0 : index
    %3 = vector.load %arg3[%c0_3, %c0_4] : memref<4x1xf32, #tpu.memory_space<vmem>>, vector<4x1xf32>
    %4 = vector.broadcast %3 : vector<4x1xf32> to vector<4x512xf32>
    %5 = arith.addf %2, %4 : vector<4x512xf32>
    %6 = math.tanh %5 : vector<4x512xf32>
    %c0_5 = arith.constant 0 : index
    %c0_6 = arith.constant 0 : index
    %7 = vector.load %arg4[%c0_5, %c0_6] : memref<4x512xf32, #tpu.memory_space<vmem>>, vector<4x512xf32>
    tpu.vector_store %arg4[%c0_5, %c0_6], %6 {strides = array<i32>} : memref<4x512xf32, #tpu.memory_space<vmem>>, vector<4x512xf32>,
    return
  }
  func.func @transform_0(%arg0: i32) -> (i32, i32) {
    %c0_i32 = arith.constant 0 : i32
    %c0_i32_0 = arith.constant 0 : i32
    %c0_i32_1 = arith.constant 0 : i32
    return %c0_i32, %c0_i32_0 : i32, i32
  }
  func.func @transform_1(%arg0: i32) -> (i32, i32) {
    %c0_i32 = arith.constant 0 : i32
    %c0_i32_0 = arith.constant 0 : i32
    %c0_i32_1 = arith.constant 0 : i32
    return %c0_i32, %c0_i32_0 : i32, i32
  }
  func.func @transform_2(%arg0: i32) -> (i32, i32) {
    %c0_i32 = arith.constant 0 : i32
    %c0_i32_0 = arith.constant 0 : i32
    %c0_i32_1 = arith.constant 0 : i32
    return %c0_i32, %c0_i32_0 : i32, i32
  }
  func.func @transform_3(%arg0: i32) -> (i32, i32) {
    %c0_i32 = arith.constant 0 : i32
    %c0_i32_0 = arith.constant 0 : i32
    %c0_i32_1 = arith.constant 0 : i32
    return %c0_i32, %c0_i32_0 : i32, i32
  }
}

</mosaic_0001>

<bundles_post_ra>
// kernel: vae_forward.8
= control target key start
LH: loop header
LB: loop body
LE: loop exit
PB: predicated region body
PF: predicated region fallthrough
CT: control target
= control target key end

     0   :  { %v176_v0 = vmov 0.0|0.0   ;;  %vm177_vm0 = vmmov 0   ;;  %v178_v4 = vmov 0.0   ;;  %v179_v7 = vmov 0   ;;  %s226_s0 = inlined_call_operand.vmem [shape: f32[36,128], index: 0, kind: input, shape index: {}]   ;;  %s227_s2 = inlined_call_operand.vmem [shape: f32[8,3], index: 2, kind: input, shape index: {}]   ;;  %s228_s1 = inlined_call_operand.vmem [shape: f32[8,36], index: 1, kind: input, shape index: {}]   ;;  %s229_s3 = inlined_call_operand.vmem [shape: f32[8,128], index: 3, kind: output, shape index: {}]  }
   0x1   :  { %158 = vmatprep.subr.bf16.mxu0 %v176_v0  ;;  %v15_v1 = vld [vmem:[%s226_s0] sm:$0xff]  ;;  %v16_v2 = vld [vmem:[%s226_s0 + $0x8] sm:$0xff]  ;;  %v17_v3 = vld [vmem:[%s226_s0 + $0x10] sm:$0xff]  ;;  %155 = vmatprep.mubr.msk.f32.mxu0 %vm177_vm0, %v178_v4  ;;  %vm30_vm1 = vcmask 1043456   ;;  %vm26_vm2 = vcmask 293888   ;;  %v180_v17 = vmov 1  }
   0x2   :  { %v159_v5 = vpack.c.bf16 %v16_v2, %v15_v1  ;;  %v18_v6 = vld [vmem:[%s226_s0 + $0x18] sm:$0xff]  ;;  %170 = vset.pattern.permute.xlu0 %v179_v7  ;;  %v20_v8 = vld [vmem:[%s227_s2] sm:$0xff]  ;;  %171 = vset.pattern.permute.xlu1 %v180_v17  ;;  %v181_v18 = vmov 2  }
   0x3   :  { %v162_v9 = vpack.c.bf16 %v18_v6, %v17_v3  ;;  %23 = vperm.xlu0 %170, %v20_v8   ;;  %v19_v10 = vld [vmem:[%s226_s0 + $0x20] sm:$0xf] }
   0x4   :  { %160 = vmatpush3.bf16.msra.mxu0 %v159_v5  ;;  %v14_v11 = vld [vmem:[%s228_s1] sm:$0xff] }
   0x5   :  { %161 = vmatprep.subr.bf16.mxu0 %v176_v0 }
   0x7   :  { %173 = vset.pattern.permute.xlu0 %v181_v18 }
   0x8   :  { %163 = vmatpush3.bf16.msra.mxu0 %v162_v9 }
   0x9   :  { %153 = vmatprep.subr.mxu0 %v178_v4 }
   0xc   :  { %154 = vmatpush3.msk.msra.mxu0 %vm30_vm1, %v19_v10 }
   0xd   :  { %156 = vmatmul.mubr.msk.f32.vlgmr.msra.gmra.mrb[0].mxu0 %vm26_vm2, %v14_v11 }
  0x82   :  { %v24_v12 = vpop.permute.xlu0 %23 }
  0xe0   :  { %v100_v13 = vpop.f32.mrb[0].mxu0 }
  0xe1   :  { %v101_v14 = vadd.f32 %v100_v13, %v24_v12  ;;  %v157_v15 = vpop.f32.mrb[1].mxu0 }
  0xe3   :  { %104 = vadd.xlane.f32.xlu0 %v101_v14  ;;  %v106_v16 = vmul.f32 %v101_v14, %v101_v14 }
  0xe5   :  { %107 = vadd.xlane.f32.xlu1 %v106_v16 }
 0x170   :  { %v105_v19 = vpop.xlane.xlu0 %104 }
 0x171   :  { %v109_v20 = vmul.f32 0.0078125, %v105_v19 }
 0x172   :  { %v108_v21 = vpop.xlane.xlu1 %107 }
 0x173   :  { %v111_v22 = vmul.f32 %v109_v20, %v109_v20  ;;  %v110_v23 = vmul.f32 0.0078125, %v108_v21  ;;  %v117_v30 = vsub.f32 %v101_v14, %v109_v20 }
 0x175   :  { %v112_v24 = vsub.f32 %v110_v23, %v111_v22 }
 0x177   :  { %v113_v25 = vmax.f32 %v112_v24, 0.0 }
 0x179   :  { %v114_v26 = vadd.f32 1e-05, %v113_v25 }
 0x17b   :  { %174 = vrsqrt.f32 %v114_v26 }
 0x185   :  { %v175_v27 = vpop.eup %174 }
 0x186   :  { %v116_v28 = vmul.f32 %v175_v27, %v20_v8 }
 0x188   :  { %120 = vperm.xlu1 %171, %v116_v28  }
 0x18c   :  { %172 = vset.pattern.permute.xlu1 %v181_v18 }
 0x18d   :  { %125 = vperm.xlu1 %172, %v20_v8  }
 0x207   :  { %v121_v29 = vpop.permute.xlu1 %120 }
 0x208   :  { %v123_v31 = vmul.f32 %v121_v29, %v117_v30 }
 0x20c   :  { %v126_v32 = vpop.permute.xlu1 %125 }
 0x20d   :  { %v128_v33 = vadd.f32 %v126_v32, %v123_v31 }
 0x20f   :  { %vm129_vm3 = vcmp.ge.f32.partialorder %v128_v33, 0.0  ;;  %v130_v34 = vmul.f32 0.01, %v128_v33 }
 0x211   :  { %v131_v35 = vsel %vm129_vm3, %v128_v33, %v130_v34 }
 0x212   :  { %132 = vst [vmem:[%s229_s3] sm:$0xff] %v131_v35 }

// kernel: vae_forward.9
= control target key start
LH: loop header
LB: loop body
LE: loop exit
PB: predicated region body
PF: predicated region fallthrough
CT: control target
= control target key end

     0   :  { %vm32_vm0 = vcmask 588800   ;;  %vm130_vm1 = vcmask 130048   ;;  %s378_s1 = inlined_call_operand.vmem [shape: f32[72,16], index: 1, kind: input, shape index: {}]   ;;  %s379_s0 = inlined_call_operand.vmem [shape: f32[32,72], index: 0, kind: input, shape index: {}]   ;;  %s380_s2 = inlined_call_operand.vmem [shape: f32[3,16], index: 2, kind: input, shape index: {}]   ;;  %s381_s3 = inlined_call_operand.vmem [shape: f32[32,16], index: 3, kind: output, shape index: {}]  }
   0x1   :  { %v18_v0 = vld [vmem:[%s378_s1] sm:$0xff]  ;;  %v19_v1 = vld [vmem:[%s378_s1 + $0x8] sm:$0xff]  ;;  %v20_v2 = vld [vmem:[%s378_s1 + $0x10] sm:$0xff] }
   0x2   :  { %v254_v3 = vpack.c.bf16 %v19_v1, %v18_v0  ;;  %v21_v4 = vld [vmem:[%s378_s1 + $0x18] sm:$0xff]  ;;  %v22_v6 = vld [vmem:[%s378_s1 + $0x20] sm:$0xff]  ;;  %v23_v7 = vld [vmem:[%s378_s1 + $0x28] sm:$0xff] }
   0x3   :  { %v258_v5 = vpack.c.bf16 %v21_v4, %v20_v2  ;;  %v14_v8 = vld [vmem:[%s379_s0] sm:$0xff]  ;;  %v16_v9 = vld [vmem:[%s379_s0 + $0x10] sm:$0xff]  ;;  %v262_v10 = vpack.c.bf16 %v23_v7, %v22_v6  ;;  %v25_v12 = vld [vmem:[%s378_s1 + $0x38] sm:$0xff]  ;;  %v174_v2 = vlaneseq }
   0x4   :  { %255 = vmatprep.subr.bf16.mxu0 %v254_v3  ;;  %270 = vmatprep.subr.bf16.mxu1 %v254_v3  ;;  %v24_v11 = vld [vmem:[%s378_s1 + $0x30] sm:$0xff]  ;;  %v26_v14 = vld [vmem:[%s378_s1 + $0x40] sm:$0xff]  ;;  %v15_v15 = vld [vmem:[%s379_s0 + $0x8] sm:$0xff] }
   0x5   :  { %257 = vmatpush3.bf16.msra.mxu0 %v254_v3  ;;  %275 = vmatpush3.bf16.msra.mxu1 %v254_v3  ;;  %v266_v13 = vpack.c.bf16 %v25_v12, %v24_v11  ;;  %v17_v16 = vld [vmem:[%s379_s0 + $0x18] sm:$0xff]  ;;  %v211_v17 = vld [vmem:[%s380_s2] ss:$0 sm:$0xff]  ;;  %v175_v3 = vshrl.u32 %v174_v2, 7  ;;  %v166_v4 = vld [vmem:[%s380_s2 + $0x1] sm:$0x1] }
   0x6   :  { %259 = vmatprep.subr.bf16.mxu0 %v258_v5  ;;  %271 = vmatprep.subr.bf16.mxu1 %v258_v5 }
   0x7   :  { %248 = vmatprep.mubr.msk.f32.mxu0 %vm32_vm0, %v14_v8  ;;  %251 = vmatprep.mubr.msk.f32.mxu1 %vm32_vm0, %v16_v9  ;;  %v216_v9 = vld [vmem:[%s380_s2 + $0x2] ss:$0 sm:$0xff] }
   0x9   :  { %261 = vmatpush3.bf16.msra.mxu0 %v258_v5  ;;  %276 = vmatpush3.bf16.msra.mxu1 %v258_v5  ;;  %v176_v5 = vsub.s32 0, %v175_v3 }
   0xa   :  { %263 = vmatprep.subr.bf16.mxu0 %v262_v10  ;;  %272 = vmatprep.subr.bf16.mxu1 %v262_v10 }
   0xd   :  { %265 = vmatpush3.bf16.msra.mxu0 %v262_v10  ;;  %277 = vmatpush3.bf16.msra.mxu1 %v262_v10 }
   0xe   :  { %267 = vmatprep.subr.bf16.mxu0 %v266_v13  ;;  %273 = vmatprep.subr.bf16.mxu1 %v266_v13 }
  0x11   :  { %269 = vmatpush3.bf16.msra.mxu0 %v266_v13  ;;  %278 = vmatpush3.bf16.msra.mxu1 %v266_v13 }
  0x12   :  { %246 = vmatprep.subr.mxu0 %v26_v14  ;;  %274 = vmatprep.subr.mxu1 %v26_v14 }
  0x15   :  { %247 = vmatpush3.msra.mxu0 %v26_v14  ;;  %279 = vmatpush3.msra.mxu1 %v26_v14 }
  0x16   :  { %249 = vmatmul.mubr.msk.f32.vlgmr.msra.gmra.mrb[0].mxu0 %vm32_vm0, %v15_v15  ;;  %252 = vmatmul.mubr.msk.f32.vlgmr.msra.gmra.mrb[0].mxu1 %vm32_vm0, %v17_v16 }
  0xe9   :  { %v250_v18 = vpop.f32.mrb[0].mxu0  ;;  %v253_v19 = vpop.f32.mrb[0].mxu1 }
  0xea   :  { %v117_v20 = vadd.f32 %v250_v18, %v211_v17  ;;  %v111_v21 = vpop.f32.mrb[1].mxu0  ;;  %v121_v22 = vpop.f32.mrb[1].mxu1  ;;  %v127_v24 = vadd.f32 %v253_v19, %v211_v17 }
  0xeb   :  { %v112_v23 = vadd.f32 %v211_v17, %v111_v21  ;;  %v122_v25 = vadd.f32 %v211_v17, %v121_v22 }
  0xec   :  { %v132_v26 = vsel %vm130_vm1, %v117_v20, 0.0  ;;  %v145_v27 = vmul.f32 %v117_v20, %v117_v20  ;;  %v147_v35 = vmul.f32 %v127_v24, %v127_v24  ;;  %v136_v39 = vsel %vm130_vm1, %v127_v24, 0.0 }
  0xed   :  { %v131_v28 = vsel %vm130_vm1, %v112_v23, 0.0  ;;  %v144_v29 = vmul.f32 %v112_v23, %v112_v23  ;;  %v134_v30 = vsel %vm130_vm1, %v122_v25, 0.0  ;;  %v146_v31 = vmul.f32 %v122_v25, %v122_v25 }
  0xee   :  { %v149_v32 = vsel %vm130_vm1, %v145_v27, 0.0  ;;  %v133_v33 = vadd.f32 %v132_v26, %v131_v28  ;;  %v153_v42 = vsel %vm130_vm1, %v147_v35, 0.0 }
  0xef   :  { %v148_v34 = vsel %vm130_vm1, %v144_v29, 0.0  ;;  %v151_v36 = vsel %vm130_vm1, %v146_v31, 0.0 }
  0xf0   :  { %v150_v37 = vadd.f32 %v149_v32, %v148_v34  ;;  %v135_v38 = vadd.f32 %v134_v30, %v133_v33 }
  0xf2   :  { %v137_v40 = vadd.f32 %v136_v39, %v135_v38  ;;  %v152_v41 = vadd.f32 %v151_v36, %v150_v37 }
  0xf4   :  { %v138_v43 = vrot.slane %v137_v40, 4  ;;  %v154_v44 = vadd.f32 %v153_v42, %v152_v41 }
  0xf6   :  { %v139_v45 = vadd.f32 %v138_v43, %v137_v40  ;;  %v155_v46 = vrot.slane %v154_v44, 4 }
  0xf8   :  { %v140_v47 = vrot.slane %v139_v45, 2  ;;  %v156_v48 = vadd.f32 %v155_v46, %v154_v44 }
  0xfa   :  { %v141_v49 = vadd.f32 %v140_v47, %v139_v45  ;;  %v157_v50 = vrot.slane %v156_v48, 2 }
  0xfc   :  { %v142_v51 = vrot.slane %v141_v49, 1  ;;  %v158_v52 = vadd.f32 %v157_v50, %v156_v48 }
  0xfe   :  { %v143_v53 = vadd.f32 %v142_v51, %v141_v49  ;;  %v159_v54 = vrot.slane %v158_v52, 1 }
 0x100   :  { %v160_v55 = vadd.f32 %v159_v54, %v158_v52  ;;  %v161_v56 = vmul.f32 0.03125, %v143_v53 }
 0x102   :  { %v162_v57 = vmul.f32 0.03125, %v160_v55  ;;  %v163_v58 = vmul.f32 %v161_v56, %v161_v56  ;;  %v170_v59 = vsub.f32 %v112_v23, %v161_v56  ;;  %v171_v60 = vsub.f32 %v117_v20, %v161_v56 }
 0x103   :  { %v172_v61 = vsub.f32 %v122_v25, %v161_v56  ;;  %v173_v62 = vsub.f32 %v127_v24, %v161_v56 }
 0x104   :  { %v164_v63 = vsub.f32 %v162_v57, %v163_v58 }
 0x106   :  { %v165_v0 = vmax.f32 %v164_v63, 0.0 }
 0x108   :  { %v167_v1 = vadd.f32 1e-05, %v165_v0 }
 0x10a   :  { %280 = vrsqrt.f32 %v167_v1 }
 0x114   :  { %v281_v6 = vpop.eup %280 }
 0x115   :  { %v169_v7 = vmul.f32 %v281_v6, %v166_v4 }
 0x117   :  { %v177_v8 = vrot.slane %v169_v7, %v176_v5 }
 0x119   :  { %v178_v10 = vmul.f32 %v177_v8, %v170_v59  ;;  %v179_v11 = vmul.f32 %v177_v8, %v171_v60  ;;  %v180_v12 = vmul.f32 %v177_v8, %v172_v61  ;;  %v181_v13 = vmul.f32 %v177_v8, %v173_v62 }
 0x11b   :  { %v187_v14 = vadd.f32 %v216_v9, %v178_v10  ;;  %v188_v15 = vadd.f32 %v216_v9, %v179_v11  ;;  %v189_v16 = vadd.f32 %v216_v9, %v180_v12  ;;  %v190_v17 = vadd.f32 %v216_v9, %v181_v13 }
 0x11d   :  { %vm191_vm2 = vcmp.ge.f32.partialorder %v187_v14, 0.0  ;;  %vm192_vm3 = vcmp.ge.f32.partialorder %v188_v15, 0.0  ;;  %vm193_vm4 = vcmp.ge.f32.partialorder %v189_v16, 0.0  ;;  %vm194_vm5 = vcmp.ge.f32.partialorder %v190_v17, 0.0 }
 0x11e   :  { %v195_v18 = vmul.f32 0.01, %v187_v14  ;;  %v196_v19 = vmul.f32 0.01, %v188_v15  ;;  %v197_v20 = vmul.f32 0.01, %v189_v16 }
 0x11f   :  { %v198_v21 = vmul.f32 0.01, %v190_v17 }
 0x120   :  { %v199_v22 = vsel %vm191_vm2, %v187_v14, %v195_v18  ;;  %v200_v23 = vsel %vm192_vm3, %v188_v15, %v196_v19  ;;  %v201_v24 = vsel %vm193_vm4, %v189_v16, %v197_v20 }
 0x121   :  { %v202_v25 = vsel %vm194_vm5, %v190_v17, %v198_v21  ;;  %203 = vst.msk [vmem:[%s381_s3] sm:$0xff] %vm130_vm1, %v199_v22  ;;  %204 = vst.msk [vmem:[%s381_s3 + $0x8] sm:$0xff] %vm130_vm1, %v200_v23 }
 0x122   :  { %205 = vst.msk [vmem:[%s381_s3 + $0x10] sm:$0xff] %vm130_vm1, %v201_v24  ;;  %206 = vst.msk [vmem:[%s381_s3 + $0x18] sm:$0xff] %vm130_vm1, %v202_v25 }

// kernel: vae_forward.10
= control target key start
LH: loop header
LB: loop body
LE: loop exit
PB: predicated region body
PF: predicated region fallthrough
CT: control target
= control target key end

     0   :  { %v191_v0 = vmov 0.0|0.0   ;;  %vm39_vm0 = vcmask 130048   ;;  %vm113_vm1 = vcmask 261120   ;;  %v139_v55 = vlaneseq  ;;  %s287_s1 = inlined_call_operand.vmem [shape: f32[144,32], index: 1, kind: input, shape index: {}]   ;;  %s288_s0 = inlined_call_operand.vmem [shape: f32[8,144], index: 0, kind: input, shape index: {}]   ;;  %s289_s2 = inlined_call_operand.vmem [shape: f32[3,32], index: 2, kind: input, shape index: {}]   ;;  %s290_s3 = inlined_call_operand.vmem [shape: f32[8,32], index: 3, kind: output, shape index: {}]  }
   0x1   :  { %161 = vmatprep.subr.bf16.mxu0 %v191_v0  ;;  %v16_v1 = vld [vmem:[%s287_s1] sm:$0xff]  ;;  %v17_v2 = vld [vmem:[%s287_s1 + $0x8] sm:$0xff]  ;;  %v18_v3 = vld [vmem:[%s287_s1 + $0x10] sm:$0xff] }
   0x2   :  { %v162_v4 = vpack.c.bf16 %v17_v2, %v16_v1  ;;  %v19_v5 = vld [vmem:[%s287_s1 + $0x18] sm:$0xff]  ;;  %v20_v7 = vld [vmem:[%s287_s1 + $0x20] sm:$0xff]  ;;  %v21_v8 = vld [vmem:[%s287_s1 + $0x28] sm:$0xff]  ;;  %v140_v56 = vshrl.u32 %v139_v55, 7 }
   0x3   :  { %v165_v6 = vpack.c.bf16 %v19_v5, %v18_v3  ;;  %v15_v9 = vld [vmem:[%s288_s0 + $0x8] sm:$0xff]  ;;  %v168_v10 = vpack.c.bf16 %v21_v8, %v20_v7  ;;  %v22_v11 = vld [vmem:[%s287_s1 + $0x30] sm:$0xff]  ;;  %v23_v12 = vld [vmem:[%s287_s1 + $0x38] sm:$0xff] }
   0x4   :  { %163 = vmatpush1.bf16.msra.mxu0 %v162_v4  ;;  %159 = vmatprep.mubr.msk.f32.mxu0 %vm39_vm0, %v15_v9  ;;  %v171_v13 = vpack.c.bf16 %v23_v12, %v22_v11  ;;  %v24_v14 = vld [vmem:[%s287_s1 + $0x40] sm:$0xff]  ;;  %v25_v15 = vld [vmem:[%s287_s1 + $0x48] sm:$0xff]  ;;  %v26_v17 = vld [vmem:[%s287_s1 + $0x50] sm:$0xff]  ;;  %v141_v58 = vsub.s32 0, %v140_v56 }
   0x5   :  { %164 = vmatprep.subr.bf16.mxu0 %v191_v0  ;;  %v174_v16 = vpack.c.bf16 %v25_v15, %v24_v14  ;;  %v27_v18 = vld [vmem:[%s287_s1 + $0x58] sm:$0xff]  ;;  %v28_v20 = vld [vmem:[%s287_s1 + $0x60] sm:$0xff]  ;;  %v29_v21 = vld [vmem:[%s287_s1 + $0x68] sm:$0xff] }
   0x6   :  { %v177_v19 = vpack.c.bf16 %v27_v18, %v26_v17  ;;  %v180_v22 = vpack.c.bf16 %v29_v21, %v28_v20  ;;  %v30_v23 = vld [vmem:[%s287_s1 + $0x70] sm:$0xff]  ;;  %v31_v24 = vld [vmem:[%s287_s1 + $0x78] sm:$0xff]  ;;  %v32_v26 = vld [vmem:[%s287_s1 + $0x80] sm:$0xff] }
   0x7   :  { %v183_v25 = vpack.c.bf16 %v31_v24, %v30_v23  ;;  %v33_v27 = vld [vmem:[%s287_s1 + $0x88] sm:$0xff]  ;;  %v14_v29 = vld [vmem:[%s288_s0] sm:$0xff] }
   0x8   :  { %166 = vmatpush1.bf16.msra.mxu0 %v165_v6  ;;  %v186_v28 = vpack.c.bf16 %v33_v27, %v32_v26  ;;  %v158_v30 = vld [vmem:[%s289_s2] ss:$0 sm:$0xff]  ;;  %v134_v57 = vld [vmem:[%s289_s2 + $0x1] sm:$0x1]  ;;  %v160_v63 = vld [vmem:[%s289_s2 + $0x2] ss:$0 sm:$0xff] }
   0x9   :  { %167 = vmatprep.subr.bf16.mxu0 %v191_v0 }
   0xc   :  { %169 = vmatpush1.bf16.msra.mxu0 %v168_v10 }
   0xd   :  { %170 = vmatprep.subr.bf16.mxu0 %v191_v0 }
  0x10   :  { %172 = vmatpush1.bf16.msra.mxu0 %v171_v13 }
  0x11   :  { %173 = vmatprep.subr.bf16.mxu0 %v191_v0 }
  0x14   :  { %175 = vmatpush1.bf16.msra.mxu0 %v174_v16 }
  0x15   :  { %176 = vmatprep.subr.bf16.mxu0 %v191_v0 }
  0x18   :  { %178 = vmatpush1.bf16.msra.mxu0 %v177_v19 }
  0x19   :  { %179 = vmatprep.subr.bf16.mxu0 %v191_v0 }
  0x1c   :  { %181 = vmatpush1.bf16.msra.mxu0 %v180_v22 }
  0x1d   :  { %182 = vmatprep.subr.bf16.mxu0 %v191_v0 }
  0x20   :  { %184 = vmatpush1.bf16.msra.mxu0 %v183_v25 }
  0x21   :  { %185 = vmatprep.subr.bf16.mxu0 %v191_v0 }
  0x24   :  { %187 = vmatpush1.bf16.msra.mxu0 %v186_v28 }
  0x27   :  { %108 = vmatmul.mubr.f32.vlgmr.msra.gmra.mrb[0].mxu0 %v14_v29 }
  0xfa   :  { %v109_v31 = vpop.f32.mrb[0].mxu0 }
  0xfb   :  { %v110_v32 = vadd.f32 %v158_v30, %v109_v31  ;;  %v111_v33 = vpop.f32.mrb[1].mxu0 }
  0xfd   :  { %v114_v34 = vsel %vm113_vm1, %v110_v32, 0.0  ;;  %v121_v35 = vmul.f32 %v110_v32, %v110_v32 }
  0xfe   :  { %v115_v36 = vrot.slane %v114_v34, 4 }
  0xff   :  { %v122_v37 = vsel %vm113_vm1, %v121_v35, 0.0 }
 0x100   :  { %v116_v38 = vadd.f32 %v115_v36, %v114_v34  ;;  %v123_v39 = vrot.slane %v122_v37, 4 }
 0x102   :  { %v117_v40 = vrot.slane %v116_v38, 2  ;;  %v124_v41 = vadd.f32 %v123_v39, %v122_v37 }
 0x104   :  { %v118_v42 = vadd.f32 %v117_v40, %v116_v38  ;;  %v125_v43 = vrot.slane %v124_v41, 2 }
 0x106   :  { %v119_v44 = vrot.slane %v118_v42, 1  ;;  %v126_v45 = vadd.f32 %v125_v43, %v124_v41 }
 0x108   :  { %v120_v46 = vadd.f32 %v119_v44, %v118_v42  ;;  %v127_v47 = vrot.slane %v126_v45, 1 }
 0x10a   :  { %v128_v48 = vadd.f32 %v127_v47, %v126_v45  ;;  %v129_v49 = vmul.f32 0.125, %v120_v46 }
 0x10c   :  { %v130_v50 = vmul.f32 0.125, %v128_v48  ;;  %v131_v51 = vmul.f32 %v129_v49, %v129_v49  ;;  %v138_v61 = vsub.f32 %v110_v32, %v129_v49 }
 0x10e   :  { %v132_v52 = vsub.f32 %v130_v50, %v131_v51 }
 0x110   :  { %v133_v53 = vmax.f32 %v132_v52, 0.0 }
 0x112   :  { %v135_v54 = vadd.f32 1e-05, %v133_v53 }
 0x114   :  { %189 = vrsqrt.f32 %v135_v54 }
 0x11e   :  { %v190_v59 = vpop.eup %189 }
 0x11f   :  { %v137_v60 = vmul.f32 %v190_v59, %v134_v57 }
 0x121   :  { %v142_v62 = vrot.slane %v137_v60, %v141_v58 }
 0x123   :  { %v143_v0 = vmul.f32 %v142_v62, %v138_v61 }
 0x125   :  { %v149_v1 = vadd.f32 %v160_v63, %v143_v0 }
 0x127   :  { %vm150_vm2 = vcmp.ge.f32.partialorder %v149_v1, 0.0  ;;  %v151_v2 = vmul.f32 0.01, %v149_v1 }
 0x129   :  { %v152_v3 = vsel %vm150_vm2, %v149_v1, %v151_v2 }
 0x12a   :  { %153 = vst.msk [vmem:[%s290_s3] sm:$0xff] %vm113_vm1, %v152_v3 }

// kernel: vae_forward.11
= control target key start
LH: loop header
LB: loop body
LE: loop exit
PB: predicated region body
PF: predicated region fallthrough
CT: control target
= control target key end

     0   :  { %15 = vsyncpa [#allocation3], 0  ;;  %v556_v3 = vmov 0.0|0.0   ;;  %vm557_vm0 = vmmov 0   ;;  %v558_v7 = vmov 0.0   ;;  %s775_s0 = inlined_call_operand.vmem [shape: f32[2,128], index: 0, kind: input, shape index: {}]   ;;  %s776_s1 = inlined_call_operand.vmem [shape: f32[128,8], index: 1, kind: input, shape index: {}]   ;;  %s777_s2 = inlined_call_operand.vmem [shape: f32[128,8], index: 2, kind: input, shape index: {}]   ;;  %s778_s3 = inlined_call_operand.vmem [shape: f32[2,8], index: 3, kind: input, shape index: {}]   ;;  %s779_s4 = inlined_call_operand.vmem [shape: f32[2,8], index: 4, kind: input, shape index: {}]   ;;  %s780_s5 = inlined_call_operand.vmem [shape: f32[8,128], index: 5, kind: input, shape index: {}]   ;;  %s781_s6 = inlined_call_operand.vmem [shape: f32[1,128], index: 6, kind: input, shape index: {}]   ;;  %s782_s7 = inlined_call_operand.hbm [shape: f32[2,8], index: 7, kind: output, shape index: {0}]   ;;  %s783_s8 = inlined_call_operand.hbm [shape: f32[2,8], index: 8, kind: output, shape index: {1}]   ;;  %s784_s9 = inlined_call_operand.vmem [shape: f32[2,128], index: 9, kind: output, shape index: {2}]  }
   0x1   :  { %v123_v0 = vld [vmem:[%s777_s2] sm:$0xff]  ;;  %v124_v1 = vld [vmem:[%s777_s2 + $0x8] sm:$0xff]  ;;  %v125_v2 = vld [vmem:[%s777_s2 + $0x10] sm:$0xff]  ;;  %477 = vmatprep.subr.bf16.mxu1 %v556_v3  ;;  %453 = vmatprep.subr.bf16.mxu0 %v556_v3 }
   0x2   :  { %v478_v4 = vpack.c.bf16 %v124_v1, %v123_v0  ;;  %v126_v5 = vld [vmem:[%s777_s2 + $0x18] sm:$0xff]  ;;  %v32_v6 = vld [vmem:[%s776_s1] sm:$0xff]  ;;  %445 = vmatprep.mubr.msk.f32.mxu1 %vm557_vm0, %v558_v7  ;;  %410 = vmatprep.mubr.msk.f32.mxu0 %vm557_vm0, %v558_v7  ;;  %v33_v10 = vld [vmem:[%s776_s1 + $0x8] sm:$0xff] }
   0x3   :  { %v481_v8 = vpack.c.bf16 %v126_v5, %v125_v2  ;;  %v127_v9 = vld [vmem:[%s777_s2 + $0x20] sm:$0xff]  ;;  %v128_v11 = vld [vmem:[%s777_s2 + $0x28] sm:$0xff]  ;;  %v454_v12 = vpack.c.bf16 %v33_v10, %v32_v6  ;;  %v34_v13 = vld [vmem:[%s776_s1 + $0x10] sm:$0xff] }
   0x4   :  { %479 = vmatpush3.bf16.msra.mxu1 %v478_v4  ;;  %v35_v14 = vld [vmem:[%s776_s1 + $0x18] sm:$0xff]  ;;  %v484_v16 = vpack.c.bf16 %v128_v11, %v127_v9  ;;  %v36_v17 = vld [vmem:[%s776_s1 + $0x20] sm:$0xff]  ;;  %v37_v18 = vld [vmem:[%s776_s1 + $0x28] sm:$0xff] }
   0x5   :  { %480 = vmatprep.subr.bf16.mxu1 %v556_v3  ;;  %455 = vmatpush3.bf16.msra.mxu0 %v454_v12  ;;  %v457_v15 = vpack.c.bf16 %v35_v14, %v34_v13  ;;  %v129_v19 = vld [vmem:[%s777_s2 + $0x30] sm:$0xff]  ;;  %v130_v20 = vld [vmem:[%s777_s2 + $0x38] sm:$0xff]  ;;  %v460_v21 = vpack.c.bf16 %v37_v18, %v36_v17 }
   0x6   :  { %456 = vmatprep.subr.bf16.mxu0 %v556_v3  ;;  %v487_v22 = vpack.c.bf16 %v130_v20, %v129_v19  ;;  %v38_v23 = vld [vmem:[%s776_s1 + $0x30] sm:$0xff]  ;;  %v39_v24 = vld [vmem:[%s776_s1 + $0x38] sm:$0xff] }
   0x8   :  { %482 = vmatpush3.bf16.msra.mxu1 %v481_v8 }
   0x9   :  { %483 = vmatprep.subr.bf16.mxu1 %v556_v3  ;;  %458 = vmatpush3.bf16.msra.mxu0 %v457_v15 }
   0xa   :  { %459 = vmatprep.subr.bf16.mxu0 %v556_v3 }
   0xc   :  { %485 = vmatpush3.bf16.msra.mxu1 %v484_v16 }
   0xd   :  { %16 = vsyncpa [#allocation5], 0  ;;  %486 = vmatprep.subr.bf16.mxu1 %v556_v3  ;;  %v131_v25 = vld [vmem:[%s777_s2 + $0x40] sm:$0xff]  ;;  %v132_v26 = vld [vmem:[%s777_s2 + $0x48] sm:$0xff]  ;;  %461 = vmatpush3.bf16.msra.mxu0 %v460_v21  ;;  %v463_v27 = vpack.c.bf16 %v39_v24, %v38_v23  ;;  %vm302_vm1 = vcmask 58368   ;;  %vm228_vm2 = vcmask 64512  }
   0xe   :  { %v490_v28 = vpack.c.bf16 %v132_v26, %v131_v25  ;;  %462 = vmatprep.subr.bf16.mxu0 %v556_v3  ;;  %v40_v29 = vld [vmem:[%s776_s1 + $0x40] sm:$0xff]  ;;  %v41_v30 = vld [vmem:[%s776_s1 + $0x48] sm:$0xff]  ;;  %v133_v31 = vld [vmem:[%s777_s2 + $0x50] sm:$0xff]  ;;  %s559_s16 = smov [#allocation2]  }
   0xf   :  { %v134_v32 = vld [vmem:[%s777_s2 + $0x58] sm:$0xff]  ;;  %v466_v33 = vpack.c.bf16 %v41_v30, %v40_v29  ;;  %v42_v35 = vld [vmem:[%s776_s1 + $0x50] sm:$0xff]  ;;  %v135_v37 = vld [vmem:[%s777_s2 + $0x60] sm:$0xff]  ;;  %s312_s17 = sshll.u32 %s559_s16, 4  ;;  %s313_s17 = int_to_ptr.vmem [resolvable:$true] %s312_s17 }
  0x10   :  { %488 = vmatpush3.bf16.msra.mxu1 %v487_v22  ;;  %v493_v34 = vpack.c.bf16 %v134_v32, %v133_v31  ;;  %v43_v36 = vld [vmem:[%s776_s1 + $0x58] sm:$0xff]  ;;  %v136_v38 = vld [vmem:[%s777_s2 + $0x68] sm:$0xff]  ;;  %v44_v41 = vld [vmem:[%s776_s1 + $0x60] sm:$0xff]  ;;  %s508_s19 = scalar_lea.vmem %s313_s17, 32  ;;  %p513_p1 = scmp.lt.s32.totalorder %s313_s17, %s313_s17 }
  0x11   :  { %489 = vmatprep.subr.bf16.mxu1 %v556_v3  ;;  %464 = vmatpush3.bf16.msra.mxu0 %v463_v27  ;;  %v469_v39 = vpack.c.bf16 %v43_v36, %v42_v35  ;;  %v496_v40 = vpack.c.bf16 %v136_v38, %v135_v37  ;;  %v45_v42 = vld [vmem:[%s776_s1 + $0x68] sm:$0xff]  ;;  %v137_v43 = vld [vmem:[%s777_s2 + $0x70] sm:$0xff]  ;;  %v138_v44 = vld [vmem:[%s777_s2 + $0x78] sm:$0xff]  ;;  %p509_p0 = scmp.ne.s32.totalorder %s313_s17, %s508_s19  ;;  %p514_p2 = scmp.lt.s32.totalorder %s508_s19, %s508_s19 }
  0x12   :  { %465 = vmatprep.subr.bf16.mxu0 %v556_v3  ;;  %v472_v45 = vpack.c.bf16 %v45_v42, %v44_v41  ;;  %v499_v46 = vpack.c.bf16 %v138_v44, %v137_v43  ;;  %v46_v47 = vld [vmem:[%s776_s1 + $0x70] sm:$0xff]  ;;  %v47_v48 = vld [vmem:[%s776_s1 + $0x78] sm:$0xff]  ;;  %v31_v50 = vld [vmem:[%s775_s0] sm:$0x3] }
  0x13   :  { %v475_v49 = vpack.c.bf16 %v47_v48, %v46_v47  ;;  %v220_v51 = vld [vmem:[%s780_s5] sm:$0xff]  ;;  %p515_p3 = por %p514_p2, %p513_p1 }
  0x14   :  { %491 = vmatpush3.bf16.msra.mxu1 %v490_v28  ;;  %v339_v52 = vld [vmem:[%s778_s3 + $0x1] ss:$0 sm:$0xff]  ;;  %v338_v56 = vld [vmem:[%s778_s3] ss:$0 sm:$0xff]  ;;  %s560_s3 = smov [#allocation4]  }
  0x15   :  { %492 = vmatprep.subr.bf16.mxu1 %v556_v3  ;;  %467 = vmatpush3.bf16.msra.mxu0 %v466_v33  ;;  %v214_v62 = vld [vmem:[%s779_s4] sm:$0x3]  ;;  %s322_s18 = sshll.u32 %s560_s3, 4  ;;  %p516_p4 = pnand %p515_p3, %p509_p0  ;;  %s323_s18 = int_to_ptr.vmem [resolvable:$true] %s322_s18 }
  0x16   :  { %468 = vmatprep.subr.bf16.mxu0 %v556_v3 }
  0x18   :  { %494 = vmatpush3.bf16.msra.mxu1 %v493_v34 }
  0x19   :  { %495 = vmatprep.subr.bf16.mxu1 %v556_v3  ;;  %470 = vmatpush3.bf16.msra.mxu0 %v469_v39 }
  0x1a   :  { %471 = vmatprep.subr.bf16.mxu0 %v556_v3 }
  0x1c   :  { %497 = vmatpush3.bf16.msra.mxu1 %v496_v40 }
  0x1d   :  { %498 = vmatprep.subr.bf16.mxu1 %v556_v3  ;;  %473 = vmatpush3.bf16.msra.mxu0 %v472_v45 }
  0x1e   :  { %474 = vmatprep.subr.bf16.mxu0 %v556_v3 }
  0x20   :  { %500 = vmatpush3.bf16.msra.mxu1 %v499_v46 }
  0x21   :  { %476 = vmatpush3.bf16.msra.mxu0 %v475_v49 }
  0x22   :  { %448 = vmatprep.subr.mxu0 %v558_v7 }
  0x23   :  { %446 = vmatmul.mubr.f32.vlgmr.msra.gmra.mrb[0].mxu1 %v31_v50 }
  0x24   :  { %411 = vmatmul.mubr.f32.vlgmr.msra.gmra.mrb[0].mxu0 %v31_v50 }
  0x25   :  { %450 = vmatprep.mubr.msk.f32.mxu0 %vm557_vm0, %v558_v7  ;;  %449 = vmatpush3.msra.mxu0 %v220_v51 }
  0xf6   :  { %v210_v53 = vpop.f32.mrb[0].mxu1 }
  0xf7   :  { %v211_v54 = vadd.f32 %v339_v52, %v210_v53  ;;  %v447_v55 = vpop.f32.mrb[1].mxu1  ;;  %v119_v58 = vpop.f32.mrb[0].mxu0 }
  0xf8   :  { %v120_v59 = vadd.f32 %v338_v56, %v119_v58  ;;  %v412_v60 = vpop.f32.mrb[1].mxu0 }
  0xf9   :  { %v215_v57 = vmul.f32 0.5, %v211_v54  ;;  %304 = vst.msk [vmem:[#allocation4] sm:$0x3] %vm302_vm1, %v211_v54 }
  0xfa   :  { %303 = vst.msk [vmem:[#allocation2] sm:$0x3] %vm302_vm1, %v120_v59 }
  0xfb   :  { %v216_v61 = vmul.f32 1.442695, %v215_v57 }
  0xfd   :  { %506 = vpow2.f32 %v216_v61 }
 0x107   :  { %v507_v63 = vpop.eup %506 }
 0x108   :  { %v218_v0 = vmul.f32 %v507_v63, %v214_v62 }
 0x10a   :  { %v219_v1 = vadd.f32 %v218_v0, %v120_v59 }
 0x10c   :  { %451 = vmatmul.mubr.msk.f32.vlgmr.msra.gmra.mrb[2].mxu0 %vm228_vm2, %v219_v1 }
 0x10d   :  { %519 = shalt.err (!%p516_p4)
}
 0x10e   :  { %s520_s21 = scalar_lea.hbm %s782_s7, 32 }
 0x10f   :  { %p521_p5 = scmp.ne.s32.totalorder %s782_s7, %s520_s21  ;;  %p524_p6 = scmp.lt.u32.totalorder %s520_s21, %s782_s7 }
 0x111   :  { %p526_p7 = pnand %p524_p6, %p521_p5 }
 0x113   :  { %529 = shalt.err (!%p526_p7)
}
 0x114   :  { %315 = dma.vmem_to_hbm [thread:$0]  %s313_s17, 32, %s782_s7, [#allocation3]  }
 0x115   :  { %s530_s28 = scalar_lea.vmem %s323_s18, 32  ;;  %p535_p9 = scmp.lt.s32.totalorder %s323_s18, %s323_s18 }
 0x116   :  { %p531_p8 = scmp.ne.s32.totalorder %s323_s18, %s530_s28  ;;  %p536_p10 = scmp.lt.s32.totalorder %s530_s28, %s530_s28 }
 0x118   :  { %p537_p11 = por %p536_p10, %p535_p9 }
 0x11a   :  { %p538_p12 = pnand %p537_p11, %p531_p8 }
 0x11c   :  { %541 = shalt.err (!%p538_p12)
}
 0x11d   :  { %s542_s2 = scalar_lea.hbm %s783_s8, 32 }
 0x11e   :  { %p543_p13 = scmp.ne.s32.totalorder %s783_s8, %s542_s2  ;;  %p546_p0 = scmp.lt.u32.totalorder %s542_s2, %s783_s8 }
 0x120   :  { %p548_p1 = pnand %p546_p0, %p543_p13 }
 0x122   :  { %551 = shalt.err (!%p548_p1)
}
 0x123   :  { %325 = dma.vmem_to_hbm [thread:$0]  %s323_s18, 32, %s783_s8, [#allocation5]   ;;  %v340_v2 = vld [vmem:[%s781_s6] ss:$0 sm:$0xff] }
 0x1df   :  { %v298_v3 = vpop.f32.mrb[2].mxu0 }
 0x1e0   :  { %v299_v4 = vadd.f32 %v340_v2, %v298_v3  ;;  %v452_v5 = vpop.f32.mrb[3].mxu0 }
 0x1e2   :  { %305 = vst [vmem:[%s784_s9] sm:$0x3] %v299_v4 }
 0x1e3   :  { %552 = dma.done.wait [#allocation3], 32  }
 0x1e4   :  { %553 = vsyncadd [#allocation3], 4294967264 }
 0x1e5   :  { %554 = dma.done.wait [#allocation5], 32  }
 0x1e6   :  { %555 = vsyncadd [#allocation5], 4294967264 }
 0x1e7   :  { %336 = vsyncpa [#allocation3], 1 }
 0x1e8   :  { %337 = vsyncpa [#allocation5], 1 }

// kernel: vae_forward.12
= control target key start
LH: loop header
LB: loop body
LE: loop exit
PB: predicated region body
PF: predicated region fallthrough
CT: control target
= control target key end

     0   :  { %v564_v3 = vmov 0   ;;  %vm191_vm0 = vcmask 64512   ;;  %s824_s0 = inlined_call_operand.vmem [shape: f32[128,8], index: 0, kind: input, shape index: {}]   ;;  %s825_s1 = inlined_call_operand.vmem [shape: f32[64,128], index: 1, kind: input, shape index: {}]   ;;  %s826_s2 = inlined_call_operand.vmem [shape: f32[64,3], index: 2, kind: input, shape index: {}]   ;;  %s827_s3 = inlined_call_operand.vmem [shape: f32[64,8], index: 3, kind: output, shape index: {}]  }
   0x1   :  { %v22_v0 = vld [vmem:[%s824_s0] sm:$0xff]  ;;  %v23_v1 = vld [vmem:[%s824_s0 + $0x8] sm:$0xff]  ;;  %v24_v2 = vld [vmem:[%s824_s0 + $0x10] sm:$0xff]  ;;  %553 = vset.pattern.permute.xlu1 %v564_v3  ;;  %552 = vset.pattern.permute.xlu0 %v564_v3 }
   0x2   :  { %v500_v4 = vpack.c.bf16 %v23_v1, %v22_v0  ;;  %v25_v5 = vld [vmem:[%s824_s0 + $0x18] sm:$0xff]  ;;  %v26_v7 = vld [vmem:[%s824_s0 + $0x20] sm:$0xff]  ;;  %v27_v8 = vld [vmem:[%s824_s0 + $0x28] sm:$0xff] }
   0x3   :  { %v504_v6 = vpack.c.bf16 %v25_v5, %v24_v2  ;;  %v508_v9 = vpack.c.bf16 %v27_v8, %v26_v7  ;;  %v14_v10 = vld [vmem:[%s825_s1] sm:$0xff]  ;;  %v28_v12 = vld [vmem:[%s824_s0 + $0x30] sm:$0xff]  ;;  %v29_v13 = vld [vmem:[%s824_s0 + $0x38] sm:$0xff] }
   0x4   :  { %501 = vmatprep.subr.bf16.mxu0 %v500_v4  ;;  %532 = vmatprep.subr.bf16.mxu1 %v500_v4  ;;  %v18_v11 = vld [vmem:[%s825_s1 + $0x20] sm:$0xff]  ;;  %v621_v14 = vld [vmem:[%s826_s2 + $0x10] sm:$0xff]  ;;  %v512_v15 = vpack.c.bf16 %v29_v13, %v28_v12  ;;  %v31_v18 = vld [vmem:[%s824_s0 + $0x48] sm:$0xff] }
   0x5   :  { %503 = vmatpush3.bf16.msra.mxu0 %v500_v4  ;;  %540 = vmatpush3.bf16.msra.mxu1 %v500_v4  ;;  %v626_v16 = vld [vmem:[%s826_s2] sm:$0xff]  ;;  %v639_v19 = vld [vmem:[%s826_s2 + $0x18] sm:$0xff]  ;;  %v644_v20 = vld [vmem:[%s826_s2 + $0x8] sm:$0xff] }
   0x6   :  { %505 = vmatprep.subr.bf16.mxu0 %v504_v6  ;;  %533 = vmatprep.subr.bf16.mxu1 %v504_v6  ;;  %v30_v17 = vld [vmem:[%s824_s0 + $0x40] sm:$0xff]  ;;  %v32_v22 = vld [vmem:[%s824_s0 + $0x50] sm:$0xff]  ;;  %v33_v23 = vld [vmem:[%s824_s0 + $0x58] sm:$0xff] }
   0x7   :  { %488 = vmatprep.mubr.f32.mxu0 %v14_v10  ;;  %494 = vmatprep.mubr.f32.mxu1 %v18_v11  ;;  %v516_v21 = vpack.c.bf16 %v31_v18, %v30_v17  ;;  %v657_v24 = vld [vmem:[%s826_s2 + $0x28] sm:$0xff]  ;;  %v662_v25 = vld [vmem:[%s826_s2 + $0x20] sm:$0xff]  ;;  %v520_v26 = vpack.c.bf16 %v33_v23, %v32_v22  ;;  %v675_v29 = vld [vmem:[%s826_s2 + $0x38] sm:$0xff] }
   0x8   :  { %58 = vperm.xlu1 %553, %v621_v14   ;;  %48 = vperm.xlu0 %552, %v626_v16   ;;  %v34_v27 = vld [vmem:[%s824_s0 + $0x60] sm:$0xff]  ;;  %v35_v28 = vld [vmem:[%s824_s0 + $0x68] sm:$0xff]  ;;  %v680_v30 = vld [vmem:[%s826_s2 + $0x30] sm:$0xff] }
   0x9   :  { %507 = vmatpush3.bf16.msra.mxu0 %v504_v6  ;;  %541 = vmatpush3.bf16.msra.mxu1 %v504_v6  ;;  %v524_v31 = vpack.c.bf16 %v35_v28, %v34_v27  ;;  %v36_v32 = vld [vmem:[%s824_s0 + $0x70] sm:$0xff]  ;;  %v37_v33 = vld [vmem:[%s824_s0 + $0x78] sm:$0xff]  ;;  %v15_v35 = vld [vmem:[%s825_s1 + $0x8] sm:$0xff] }
   0xa   :  { %509 = vmatprep.subr.bf16.mxu0 %v508_v9  ;;  %534 = vmatprep.subr.bf16.mxu1 %v508_v9  ;;  %v528_v34 = vpack.c.bf16 %v37_v33, %v36_v32  ;;  %v19_v36 = vld [vmem:[%s825_s1 + $0x28] sm:$0xff]  ;;  %v16_v37 = vld [vmem:[%s825_s1 + $0x10] sm:$0xff]  ;;  %v17_v39 = vld [vmem:[%s825_s1 + $0x18] sm:$0xff]  ;;  %v565_v33 = vmov 2  }
   0xb   :  { %v20_v38 = vld [vmem:[%s825_s1 + $0x30] sm:$0xff]  ;;  %v21_v40 = vld [vmem:[%s825_s1 + $0x38] sm:$0xff]  ;;  %s566_s1 = smov 1  }
   0xc   :  { %63 = vperm.xlu1 %553, %v639_v19   ;;  %53 = vperm.xlu0 %552, %v644_v20  }
   0xd   :  { %511 = vmatpush3.bf16.msra.mxu0 %v508_v9  ;;  %542 = vmatpush3.bf16.msra.mxu1 %v508_v9 }
   0xe   :  { %513 = vmatprep.subr.bf16.mxu0 %v512_v15  ;;  %535 = vmatprep.subr.bf16.mxu1 %v512_v15 }
  0x10   :  { %73 = vperm.xlu1 %553, %v657_v24   ;;  %68 = vperm.xlu0 %552, %v662_v25  }
  0x11   :  { %515 = vmatpush3.bf16.msra.mxu0 %v512_v15  ;;  %543 = vmatpush3.bf16.msra.mxu1 %v512_v15 }
  0x12   :  { %517 = vmatprep.subr.bf16.mxu0 %v516_v21  ;;  %536 = vmatprep.subr.bf16.mxu1 %v516_v21 }
  0x14   :  { %83 = vperm.xlu1 %553, %v675_v29   ;;  %78 = vperm.xlu0 %552, %v680_v30  }
  0x15   :  { %519 = vmatpush3.bf16.msra.mxu0 %v516_v21  ;;  %544 = vmatpush3.bf16.msra.mxu1 %v516_v21 }
  0x16   :  { %521 = vmatprep.subr.bf16.mxu0 %v520_v26  ;;  %537 = vmatprep.subr.bf16.mxu1 %v520_v26 }
  0x18   :  { %555 = vset.pattern.permute.xlu0 %v565_v33 }
  0x19   :  { %523 = vmatpush3.bf16.msra.mxu0 %v520_v26  ;;  %545 = vmatpush3.bf16.msra.mxu1 %v520_v26 }
  0x1a   :  { %525 = vmatprep.subr.bf16.mxu0 %v524_v31  ;;  %538 = vmatprep.subr.bf16.mxu1 %v524_v31 }
  0x1d   :  { %527 = vmatpush3.bf16.msra.mxu0 %v524_v31  ;;  %546 = vmatpush3.bf16.msra.mxu1 %v524_v31 }
  0x1e   :  { %529 = vmatprep.subr.bf16.mxu0 %v528_v34  ;;  %539 = vmatprep.subr.bf16.mxu1 %v528_v34 }
  0x21   :  { %531 = vmatpush3.bf16.msra.mxu0 %v528_v34  ;;  %547 = vmatpush3.bf16.msra.mxu1 %v528_v34 }
  0x24   :  { %489 = vmatmul.mubr.f32.vlgmr.msra.gmra.mrb[0].mxu0 %v15_v35  ;;  %495 = vmatmul.mubr.f32.vlgmr.msra.gmra.mrb[0].mxu1 %v19_v36 }
  0x25   :  { %491 = vmatprep.mubr.f32.mxu0 %v16_v37  ;;  %497 = vmatprep.mubr.f32.mxu1 %v20_v38 }
  0x28   :  { %492 = vmatmul.mubr.f32.gmra.mrb[2].mxu0 %v17_v39  ;;  %498 = vmatmul.mubr.f32.gmra.mrb[2].mxu1 %v21_v40 }
  0x87   :  { %v59_v41 = vpop.permute.xlu1 %58  ;;  %v49_v42 = vpop.permute.xlu0 %48 }
  0x8b   :  { %v64_v43 = vpop.permute.xlu1 %63  ;;  %v54_v44 = vpop.permute.xlu0 %53 }
  0x8f   :  { %v74_v45 = vpop.permute.xlu1 %73  ;;  %v69_v52 = vpop.permute.xlu0 %68 }
  0x93   :  { %v79_v5 = vpop.permute.xlu0 %78  ;;  %v84_v11 = vpop.permute.xlu1 %83 }
  0xf7   :  { %v490_v46 = vpop.f32.mrb[0].mxu0  ;;  %v496_v47 = vpop.f32.mrb[0].mxu1 }
  0xf8   :  { %v708_v48 = vadd.f32 %v490_v46, %v54_v44  ;;  %v710_v49 = vadd.f32 %v496_v47, %v74_v45  ;;  %v172_v50 = vpop.f32.mrb[1].mxu1  ;;  %v152_v51 = vpop.f32.mrb[1].mxu0 }
  0xf9   :  { %v712_v53 = vadd.f32 %v172_v50, %v69_v52  ;;  %v714_v54 = vadd.f32 %v152_v51, %v49_v42 }
  0xfa   :  { %v207_v55 = vsel %vm191_vm0, %v710_v49, 0.0  ;;  %v195_v56 = vsel %vm191_vm0, %v708_v48, 0.0  ;;  %v217_v0 = vmul.f32 %v708_v48, %v708_v48  ;;  %v221_v4 = vmul.f32 %v710_v49, %v710_v49 }
  0xfb   :  { %208 = vadd.xlane.f32.xlu0 %v207_v55  ;;  %v499_v57 = vpop.f32.mrb[2].mxu1  ;;  %196 = vadd.xlane.f32.xlu1 %v195_v56  ;;  %v493_v58 = vpop.f32.mrb[2].mxu0  ;;  %v204_v61 = vsel %vm191_vm0, %v712_v53, 0.0  ;;  %v192_v62 = vsel %vm191_vm0, %v714_v54, 0.0  ;;  %v216_v63 = vmul.f32 %v714_v54, %v714_v54  ;;  %v220_v3 = vmul.f32 %v712_v53, %v712_v53 }
  0xfc   :  { %v162_v59 = vpop.f32.mrb[3].mxu0  ;;  %v182_v60 = vpop.f32.mrb[3].mxu1  ;;  %v227_v2 = vsel %vm191_vm0, %v217_v0, 0.0  ;;  %v734_v6 = vadd.f32 %v493_v58, %v64_v43  ;;  %v239_v10 = vsel %vm191_vm0, %v221_v4, 0.0  ;;  %v742_v12 = vadd.f32 %v499_v57, %v84_v11 }
  0xfd   :  { %v224_v1 = vsel %vm191_vm0, %v216_v63, 0.0  ;;  %v736_v7 = vadd.f32 %v162_v59, %v59_v41  ;;  %v738_v8 = vadd.f32 %v182_v60, %v79_v5  ;;  %v236_v9 = vsel %vm191_vm0, %v220_v3, 0.0 }
  0xfe   :  { %v201_v15 = vsel %vm191_vm0, %v734_v6, 0.0  ;;  %v213_v21 = vsel %vm191_vm0, %v742_v12, 0.0  ;;  %v219_v27 = vmul.f32 %v734_v6, %v734_v6  ;;  %v223_v31 = vmul.f32 %v742_v12, %v742_v12 }
  0xff   :  { %205 = vadd.xlane.f32.xlu1 %v204_v61  ;;  %193 = vadd.xlane.f32.xlu0 %v192_v62  ;;  %v210_v13 = vsel %vm191_vm0, %v738_v8, 0.0  ;;  %v218_v17 = vmul.f32 %v736_v7, %v736_v7  ;;  %v222_v22 = vmul.f32 %v738_v8, %v738_v8  ;;  %v198_v26 = vsel %vm191_vm0, %v736_v7, 0.0 }
 0x100   :  { %v233_v28 = vsel %vm191_vm0, %v219_v27, 0.0  ;;  %v245_v32 = vsel %vm191_vm0, %v223_v31, 0.0 }
 0x101   :  { %v230_v18 = vsel %vm191_vm0, %v218_v17, 0.0  ;;  %v242_v23 = vsel %vm191_vm0, %v222_v22, 0.0 }
 0x103   :  { %225 = vadd.xlane.f32.xlu1 %v224_v1  ;;  %228 = vadd.xlane.f32.xlu0 %v227_v2 }
 0x107   :  { %237 = vadd.xlane.f32.xlu1 %v236_v9  ;;  %240 = vadd.xlane.f32.xlu0 %v239_v10 }
 0x10b   :  { %211 = vadd.xlane.f32.xlu1 %v210_v13  ;;  %202 = vadd.xlane.f32.xlu0 %v201_v15 }
 0x10f   :  { %231 = vadd.xlane.f32.xlu1 %v230_v18  ;;  %214 = vadd.xlane.f32.xlu0 %v213_v21 }
 0x113   :  { %243 = vadd.xlane.f32.xlu1 %v242_v23  ;;  %199 = vadd.xlane.f32.xlu0 %v198_v26  ;;  %v567_v26 = vmov 1  }
 0x117   :  { %234 = vadd.xlane.f32.xlu0 %v233_v28 }
 0x11b   :  { %246 = vadd.xlane.f32.xlu0 %v245_v32 }
 0x188   :  { %v209_v34 = vpop.xlane.xlu0 %208  ;;  %v197_v35 = vpop.xlane.xlu1 %196 }
 0x18c   :  { %v206_v36 = vpop.xlane.xlu1 %205  ;;  %v194_v37 = vpop.xlane.xlu0 %193 }
 0x190   :  { %v226_v38 = vpop.xlane.xlu1 %225  ;;  %v229_v39 = vpop.xlane.xlu0 %228 }
 0x194   :  { %v238_v40 = vpop.xlane.xlu1 %237  ;;  %v241_v41 = vpop.xlane.xlu0 %240 }
 0x198   :  { %v212_v42 = vpop.xlane.xlu1 %211  ;;  %v203_v43 = vpop.xlane.xlu0 %202 }
 0x199   :  { %v249_v44 = vadd.f32 %v203_v43, %v197_v35 }
 0x19b   :  { %v251_v50 = vadd.f32 %v249_v44, %v209_v34 }
 0x19c   :  { %v232_v45 = vpop.xlane.xlu1 %231  ;;  %v215_v46 = vpop.xlane.xlu0 %214 }
 0x19d   :  { %v254_v47 = vadd.f32 %v232_v45, %v226_v38  ;;  %v253_v57 = vadd.f32 %v251_v50, %v215_v46 }
 0x19f   :  { %v256_v52 = vadd.f32 %v254_v47, %v238_v40  ;;  %v261_v63 = vmul.f32 0.03125, %v253_v57 }
 0x1a0   :  { %v200_v51 = vpop.xlane.xlu0 %199  ;;  %v244_v56 = vpop.xlane.xlu1 %243 }
 0x1a1   :  { %v248_v55 = vadd.f32 %v200_v51, %v194_v37  ;;  %v258_v60 = vadd.f32 %v256_v52, %v244_v56  ;;  %v265_v9 = vmul.f32 %v261_v63, %v261_v63 }
 0x1a3   :  { %v250_v58 = vadd.f32 %v248_v55, %v206_v36  ;;  %v262_v3 = vmul.f32 0.03125, %v258_v60 }
 0x1a4   :  { %v235_v59 = vpop.xlane.xlu0 %234 }
 0x1a5   :  { %v252_v61 = vadd.f32 %v250_v58, %v212_v42  ;;  %v255_v62 = vadd.f32 %v235_v59, %v229_v39 }
 0x1a7   :  { %v260_v0 = vmul.f32 0.03125, %v252_v61  ;;  %v257_v1 = vadd.f32 %v255_v62, %v241_v41 }
 0x1a8   :  { %v247_v2 = vpop.xlane.xlu0 %246 }
 0x1a9   :  { %v264_v4 = vmul.f32 %v260_v0, %v260_v0  ;;  %v259_v5 = vadd.f32 %v257_v1, %v247_v2 }
 0x1ab   :  { %v266_v10 = vsub.f32 %v262_v3, %v264_v4  ;;  %v263_v11 = vmul.f32 0.03125, %v259_v5 }
 0x1ad   :  { %v268_v13 = vmax.f32 %v266_v10, 0.0  ;;  %v267_v15 = vsub.f32 %v263_v11, %v265_v9 }
 0x1af   :  { %v270_v17 = vadd.f32 1e-05, %v268_v13  ;;  %v269_v18 = vmax.f32 %v267_v15, 0.0 }
 0x1b1   :  { %560 = vrsqrt.f32 %v270_v17  ;;  %v271_v21 = vadd.f32 1e-05, %v269_v18 }
 0x1b3   :  { %562 = vrsqrt.f32 %v271_v21 }
 0x1bb   :  { %v561_v22 = vpop.eup %560 }
 0x1bc   :  { %276 = vrot.lane.b32.xlu1 %v561_v22, %s566_s1 }
 0x1bd   :  { %v563_v23 = vpop.eup %562 }
 0x1be   :  { %278 = vrot.lane.b32.xlu0 %v563_v23, %s566_s1 }
 0x1c0   :  { %292 = vperm.xlu1 %553, %v260_v0  }
 0x1c2   :  { %361 = vperm.xlu0 %555, %v644_v20  }
 0x1c4   :  { %297 = vperm.xlu1 %553, %v261_v63  }
 0x1c6   :  { %373 = vperm.xlu0 %555, %v662_v25  }
 0x1c8   :  { %554 = vset.pattern.permute.xlu1 %v565_v33 }
 0x1c9   :  { %357 = vperm.xlu1 %554, %v626_v16  }
 0x1ca   :  { %557 = vset.pattern.permute.xlu0 %v567_v26 }
 0x1cd   :  { %365 = vperm.xlu1 %554, %v621_v14  }
 0x1d1   :  { %369 = vperm.xlu1 %554, %v639_v19  }
 0x1d5   :  { %377 = vperm.xlu1 %554, %v657_v24  }
 0x1d9   :  { %556 = vset.pattern.permute.xlu1 %v567_v26 }
 0x22e   :  { %v277_v32 = vpop.permute.xlu1 %276 }
 0x22f   :  { %v284_v35 = vmul.f32 %v277_v32, %v621_v14  ;;  %v286_v37 = vmul.f32 %v277_v32, %v662_v25  ;;  %v282_v38 = vmul.f32 %v277_v32, %v626_v16 }
 0x230   :  { %v279_v27 = vpop.permute.xlu0 %278 }
 0x231   :  { %v285_v28 = vmul.f32 %v279_v27, %v639_v19  ;;  %v283_v31 = vmul.f32 %v279_v27, %v644_v20  ;;  %v287_v34 = vmul.f32 %v279_v27, %v657_v24  ;;  %v289_v36 = vmul.f32 %v279_v27, %v675_v29 }
 0x232   :  { %v288_v19 = vmul.f32 %v277_v32, %v680_v30 }
 0x233   :  { %325 = vperm.xlu0 %557, %v285_v28   ;;  %315 = vperm.xlu1 %556, %v283_v31  }
 0x237   :  { %335 = vperm.xlu0 %557, %v287_v34   ;;  %320 = vperm.xlu1 %556, %v284_v35  }
 0x23b   :  { %345 = vperm.xlu0 %557, %v289_v36   ;;  %330 = vperm.xlu1 %556, %v286_v37  }
 0x23f   :  { %310 = vperm.xlu0 %557, %v282_v38   ;;  %340 = vperm.xlu1 %556, %v288_v19   ;;  %v293_v14 = vpop.permute.xlu1 %292 }
 0x240   :  { %v304_v59 = vsub.f32 %v712_v53, %v293_v14  ;;  %v300_v1 = vsub.f32 %v714_v54, %v293_v14  ;;  %v306_v54 = vsub.f32 %v738_v8, %v293_v14 }
 0x241   :  { %v362_v40 = vpop.permute.xlu0 %361 }
 0x243   :  { %558 = vset.pattern.permute.xlu0 %v565_v33  ;;  %559 = vset.pattern.permute.xlu1 %v565_v33  ;;  %v298_v20 = vpop.permute.xlu1 %297 }
 0x244   :  { %381 = vperm.xlu0 %558, %v680_v30   ;;  %385 = vperm.xlu1 %559, %v675_v29   ;;  %v301_v42 = vsub.f32 %v708_v48, %v298_v20  ;;  %v303_v43 = vsub.f32 %v734_v6, %v298_v20  ;;  %v302_v29 = vsub.f32 %v736_v7, %v293_v14 }
 0x245   :  { %v374_v16 = vpop.permute.xlu0 %373  ;;  %v305_v51 = vsub.f32 %v710_v49, %v298_v20  ;;  %v307_v11 = vsub.f32 %v742_v12, %v298_v20 }
 0x248   :  { %v358_v24 = vpop.permute.xlu1 %357 }
 0x24c   :  { %v366_v25 = vpop.permute.xlu1 %365 }
 0x250   :  { %v370_v39 = vpop.permute.xlu1 %369 }
 0x254   :  { %v378_v41 = vpop.permute.xlu1 %377 }
 0x2b2   :  { %v316_v44 = vpop.permute.xlu1 %315  ;;  %v326_v45 = vpop.permute.xlu0 %325 }
 0x2b3   :  { %v349_v46 = vmul.f32 %v316_v44, %v301_v42  ;;  %v351_v33 = vmul.f32 %v326_v45, %v303_v43 }
 0x2b5   :  { %v389_v47 = vadd.f32 %v362_v40, %v349_v46  ;;  %v391_v30 = vadd.f32 %v370_v39, %v351_v33 }
 0x2b6   :  { %v321_v50 = vpop.permute.xlu1 %320  ;;  %v336_v52 = vpop.permute.xlu0 %335 }
 0x2b7   :  { %vm397_vm1 = vcmp.ge.f32.partialorder %v389_v47, 0.0  ;;  %v405_v55 = vmul.f32 0.01, %v389_v47  ;;  %vm399_vm2 = vcmp.ge.f32.partialorder %v391_v30, 0.0  ;;  %v407_v56 = vmul.f32 0.01, %v391_v30 }
 0x2b8   :  { %v350_v57 = vmul.f32 %v321_v50, %v302_v29  ;;  %v353_v48 = vmul.f32 %v336_v52, %v305_v51 }
 0x2b9   :  { %v413_v58 = vsel %vm397_vm1, %v389_v47, %v405_v55  ;;  %v415_v6 = vsel %vm399_vm2, %v391_v30, %v407_v56 }
 0x2ba   :  { %421 = vst.msk [vmem:[%s827_s3 + $0x8] sm:$0xff] %vm191_vm0, %v413_v58  ;;  %423 = vst.msk [vmem:[%s827_s3 + $0x18] sm:$0xff] %vm191_vm0, %v415_v6  ;;  %v390_v49 = vadd.f32 %v366_v25, %v350_v57  ;;  %v393_v7 = vadd.f32 %v378_v41, %v353_v48  ;;  %v331_v60 = vpop.permute.xlu1 %330  ;;  %v346_v61 = vpop.permute.xlu0 %345 }
 0x2bb   :  { %v352_v62 = vmul.f32 %v331_v60, %v304_v59  ;;  %v355_v17 = vmul.f32 %v346_v61, %v307_v11 }
 0x2bc   :  { %vm398_vm3 = vcmp.ge.f32.partialorder %v390_v49, 0.0  ;;  %v406_v63 = vmul.f32 0.01, %v390_v49  ;;  %vm401_vm4 = vcmp.ge.f32.partialorder %v393_v7, 0.0  ;;  %v409_v0 = vmul.f32 0.01, %v393_v7 }
 0x2bd   :  { %v392_v53 = vadd.f32 %v374_v16, %v352_v62 }
 0x2be   :  { %v414_v2 = vsel %vm398_vm3, %v390_v49, %v406_v63  ;;  %v417_v3 = vsel %vm401_vm4, %v393_v7, %v409_v0  ;;  %v341_v4 = vpop.permute.xlu1 %340  ;;  %v311_v5 = vpop.permute.xlu0 %310 }
 0x2bf   :  { %422 = vst.msk [vmem:[%s827_s3 + $0x10] sm:$0xff] %vm191_vm0, %v414_v2  ;;  %425 = vst.msk [vmem:[%s827_s3 + $0x28] sm:$0xff] %vm191_vm0, %v417_v3  ;;  %vm400_vm5 = vcmp.ge.f32.partialorder %v392_v53, 0.0  ;;  %v408_v9 = vmul.f32 0.01, %v392_v53  ;;  %v348_v10 = vmul.f32 %v311_v5, %v300_v1  ;;  %v354_v18 = vmul.f32 %v341_v4, %v306_v54 }
 0x2c1   :  { %v416_v13 = vsel %vm400_vm5, %v392_v53, %v408_v9  ;;  %v388_v15 = vadd.f32 %v358_v24, %v348_v10 }
 0x2c2   :  { %424 = vst.msk [vmem:[%s827_s3 + $0x20] sm:$0xff] %vm191_vm0, %v416_v13 }
 0x2c3   :  { %vm396_vm6 = vcmp.ge.f32.partialorder %v388_v15, 0.0  ;;  %v404_v21 = vmul.f32 0.01, %v388_v15  ;;  %v386_v22 = vpop.permute.xlu1 %385  ;;  %v382_v23 = vpop.permute.xlu0 %381 }
 0x2c4   :  { %v395_v26 = vadd.f32 %v386_v22, %v355_v17  ;;  %v394_v27 = vadd.f32 %v382_v23, %v354_v18 }
 0x2c5   :  { %v412_v28 = vsel %vm396_vm6, %v388_v15, %v404_v21 }
 0x2c6   :  { %420 = vst.msk [vmem:[%s827_s3] sm:$0xff] %vm191_vm0, %v412_v28  ;;  %vm403_vm7 = vcmp.ge.f32.partialorder %v395_v26, 0.0  ;;  %v411_v8 = vmul.f32 0.01, %v395_v26  ;;  %vm402_vm8 = vcmp.ge.f32.partialorder %v394_v27, 0.0 }
 0x2c7   :  { %v410_v12 = vmul.f32 0.01, %v394_v27 }
 0x2c8   :  { %v419_v31 = vsel %vm403_vm7, %v395_v26, %v411_v8 }
 0x2c9   :  { %v418_v32 = vsel %vm402_vm8, %v394_v27, %v410_v12  ;;  %427 = vst.msk [vmem:[%s827_s3 + $0x38] sm:$0xff] %vm191_vm0, %v419_v31 }
 0x2ca   :  { %426 = vst.msk [vmem:[%s827_s3 + $0x30] sm:$0xff] %vm191_vm0, %v418_v32 }

// kernel: vae_forward.13
= control target key start
LH: loop header
LB: loop body
LE: loop exit
PB: predicated region body
PF: predicated region fallthrough
CT: control target
= control target key end

     0   :  { %v348_v3 = vmov 0   ;;  %vm50_vm0 = vcmask 523264   ;;  %vm148_vm1 = vcmask 261120   ;;  %v349_v58 = vmov 2   ;;  %s492_s0 = inlined_call_operand.vmem [shape: f32[64,32], index: 0, kind: input, shape index: {}]   ;;  %s493_s1 = inlined_call_operand.vmem [shape: f32[32,64], index: 1, kind: input, shape index: {}]   ;;  %s494_s2 = inlined_call_operand.vmem [shape: f32[32,3], index: 2, kind: input, shape index: {}]   ;;  %s495_s3 = inlined_call_operand.vmem [shape: f32[32,32], index: 3, kind: output, shape index: {}]  }
   0x1   :  { %v18_v0 = vld [vmem:[%s492_s0] sm:$0xff]  ;;  %v19_v1 = vld [vmem:[%s492_s0 + $0x8] sm:$0xff]  ;;  %v20_v2 = vld [vmem:[%s492_s0 + $0x10] sm:$0xff]  ;;  %338 = vset.pattern.permute.xlu1 %v348_v3  ;;  %337 = vset.pattern.permute.xlu0 %v348_v3 }
   0x2   :  { %v309_v4 = vpack.c.bf16 %v19_v1, %v18_v0  ;;  %v21_v5 = vld [vmem:[%s492_s0 + $0x18] sm:$0xff]  ;;  %v22_v7 = vld [vmem:[%s492_s0 + $0x20] sm:$0xff]  ;;  %v23_v8 = vld [vmem:[%s492_s0 + $0x28] sm:$0xff] }
   0x3   :  { %v313_v6 = vpack.c.bf16 %v21_v5, %v20_v2  ;;  %v14_v9 = vld [vmem:[%s493_s1] sm:$0xff]  ;;  %v16_v10 = vld [vmem:[%s493_s1 + $0x10] sm:$0xff]  ;;  %v317_v13 = vpack.c.bf16 %v23_v8, %v22_v7  ;;  %v25_v15 = vld [vmem:[%s492_s0 + $0x38] sm:$0xff]  ;;  %v350_v2 = vmov 1  }
   0x4   :  { %310 = vmatprep.subr.bf16.mxu0 %v309_v4  ;;  %325 = vmatprep.subr.bf16.mxu1 %v309_v4  ;;  %v399_v11 = vld [vmem:[%s494_s2 + $0x10] sm:$0xff]  ;;  %v404_v12 = vld [vmem:[%s494_s2] sm:$0xff]  ;;  %v419_v16 = vld [vmem:[%s494_s2 + $0x18] sm:$0xff] }
   0x5   :  { %312 = vmatpush3.bf16.msra.mxu0 %v309_v4  ;;  %329 = vmatpush3.bf16.msra.mxu1 %v309_v4  ;;  %v24_v14 = vld [vmem:[%s492_s0 + $0x30] sm:$0xff]  ;;  %v424_v17 = vld [vmem:[%s494_s2 + $0x8] sm:$0xff]  ;;  %v17_v20 = vld [vmem:[%s493_s1 + $0x18] sm:$0xff] }
   0x6   :  { %314 = vmatprep.subr.bf16.mxu0 %v313_v6  ;;  %326 = vmatprep.subr.bf16.mxu1 %v313_v6  ;;  %v321_v18 = vpack.c.bf16 %v25_v15, %v24_v14  ;;  %v15_v19 = vld [vmem:[%s493_s1 + $0x8] sm:$0xff]  ;;  %s351_s1 = smov 1  }
   0x7   :  { %303 = vmatprep.mubr.msk.f32.mxu0 %vm50_vm0, %v14_v9  ;;  %306 = vmatprep.mubr.msk.f32.mxu1 %vm50_vm0, %v16_v10 }
   0x8   :  { %42 = vperm.xlu1 %338, %v399_v11   ;;  %32 = vperm.xlu0 %337, %v404_v12  }
   0x9   :  { %316 = vmatpush3.bf16.msra.mxu0 %v313_v6  ;;  %330 = vmatpush3.bf16.msra.mxu1 %v313_v6 }
   0xa   :  { %318 = vmatprep.subr.bf16.mxu0 %v317_v13  ;;  %327 = vmatprep.subr.bf16.mxu1 %v317_v13 }
   0xc   :  { %47 = vperm.xlu1 %338, %v419_v16   ;;  %37 = vperm.xlu0 %337, %v424_v17  }
   0xd   :  { %320 = vmatpush3.bf16.msra.mxu0 %v317_v13  ;;  %331 = vmatpush3.bf16.msra.mxu1 %v317_v13 }
   0xe   :  { %322 = vmatprep.subr.bf16.mxu0 %v321_v18  ;;  %328 = vmatprep.subr.bf16.mxu1 %v321_v18 }
  0x10   :  { %339 = vset.pattern.permute.xlu1 %v349_v58 }
  0x11   :  { %324 = vmatpush3.bf16.msra.mxu0 %v321_v18  ;;  %332 = vmatpush3.bf16.msra.mxu1 %v321_v18 }
  0x14   :  { %304 = vmatmul.mubr.msk.f32.vlgmr.msra.gmra.mrb[0].mxu0 %vm50_vm0, %v15_v19  ;;  %307 = vmatmul.mubr.msk.f32.vlgmr.msra.gmra.mrb[0].mxu1 %vm50_vm0, %v17_v20 }
  0x87   :  { %v33_v21 = vpop.permute.xlu0 %32  ;;  %v43_v22 = vpop.permute.xlu1 %42 }
  0x8b   :  { %v38_v23 = vpop.permute.xlu0 %37  ;;  %v48_v24 = vpop.permute.xlu1 %47 }
  0xe7   :  { %v305_v25 = vpop.f32.mrb[0].mxu0  ;;  %v308_v26 = vpop.f32.mrb[0].mxu1 }
  0xe8   :  { %v436_v27 = vadd.f32 %v305_v25, %v38_v23  ;;  %v438_v28 = vadd.f32 %v308_v26, %v48_v24  ;;  %v139_v29 = vpop.f32.mrb[1].mxu1  ;;  %v129_v30 = vpop.f32.mrb[1].mxu0 }
  0xe9   :  { %v440_v31 = vadd.f32 %v139_v29, %v43_v22  ;;  %v442_v32 = vadd.f32 %v129_v30, %v33_v21 }
  0xea   :  { %v158_v33 = vsel %vm148_vm1, %v438_v28, 0.0  ;;  %v152_v34 = vsel %vm148_vm1, %v436_v27, 0.0  ;;  %v162_v35 = vmul.f32 %v436_v27, %v436_v27  ;;  %v164_v43 = vmul.f32 %v438_v28, %v438_v28 }
  0xeb   :  { %159 = vadd.xlane.f32.xlu0 %v158_v33  ;;  %153 = vadd.xlane.f32.xlu1 %v152_v34  ;;  %v149_v37 = vsel %vm148_vm1, %v442_v32, 0.0  ;;  %v163_v38 = vmul.f32 %v440_v31, %v440_v31  ;;  %v155_v40 = vsel %vm148_vm1, %v440_v31, 0.0  ;;  %v161_v41 = vmul.f32 %v442_v32, %v442_v32 }
  0xec   :  { %v168_v36 = vsel %vm148_vm1, %v162_v35, 0.0  ;;  %v174_v44 = vsel %vm148_vm1, %v164_v43, 0.0 }
  0xed   :  { %v171_v39 = vsel %vm148_vm1, %v163_v38, 0.0  ;;  %v165_v42 = vsel %vm148_vm1, %v161_v41, 0.0 }
  0xef   :  { %169 = vadd.xlane.f32.xlu1 %v168_v36  ;;  %150 = vadd.xlane.f32.xlu0 %v149_v37 }
  0xf3   :  { %172 = vadd.xlane.f32.xlu1 %v171_v39  ;;  %156 = vadd.xlane.f32.xlu0 %v155_v40 }
  0xf7   :  { %166 = vadd.xlane.f32.xlu0 %v165_v42 }
  0xfb   :  { %175 = vadd.xlane.f32.xlu0 %v174_v44 }
 0x178   :  { %v160_v45 = vpop.xlane.xlu0 %159  ;;  %v154_v46 = vpop.xlane.xlu1 %153 }
 0x17c   :  { %v151_v47 = vpop.xlane.xlu0 %150  ;;  %v170_v49 = vpop.xlane.xlu1 %169 }
 0x17d   :  { %v177_v48 = vadd.f32 %v154_v46, %v151_v47 }
 0x180   :  { %v157_v50 = vpop.xlane.xlu0 %156  ;;  %v173_v56 = vpop.xlane.xlu1 %172 }
 0x181   :  { %v178_v51 = vadd.f32 %v177_v48, %v157_v50 }
 0x183   :  { %v179_v52 = vadd.f32 %v178_v51, %v160_v45 }
 0x184   :  { %v167_v53 = vpop.xlane.xlu0 %166 }
 0x185   :  { %v183_v54 = vmul.f32 0.0078125, %v179_v52  ;;  %v180_v55 = vadd.f32 %v170_v49, %v167_v53 }
 0x187   :  { %200 = vperm.xlu0 %337, %v183_v54   ;;  %v181_v57 = vadd.f32 %v180_v55, %v173_v56  ;;  %v185_v61 = vmul.f32 %v183_v54, %v183_v54 }
 0x188   :  { %v176_v59 = vpop.xlane.xlu0 %175 }
 0x189   :  { %v182_v60 = vadd.f32 %v181_v57, %v176_v59 }
 0x18b   :  { %v184_v62 = vmul.f32 0.0078125, %v182_v60  ;;  %341 = vset.pattern.permute.xlu0 %v350_v2 }
 0x18d   :  { %v186_v63 = vsub.f32 %v184_v62, %v185_v61 }
 0x18f   :  { %v187_v0 = vmax.f32 %v186_v63, 0.0 }
 0x191   :  { %v188_v1 = vadd.f32 1e-05, %v187_v0 }
 0x193   :  { %346 = vrsqrt.f32 %v188_v1 }
 0x19d   :  { %v347_v3 = vpop.eup %346 }
 0x19e   :  { %191 = vrot.lane.b32.xlu1 %v347_v3, %s351_s1 }
 0x1a2   :  { %232 = vperm.xlu1 %339, %v404_v12  }
 0x1a6   :  { %340 = vset.pattern.permute.xlu1 %v350_v2 }
 0x206   :  { %v201_v10 = vpop.permute.xlu0 %200 }
 0x207   :  { %v205_v22 = vsub.f32 %v440_v31, %v201_v10  ;;  %v206_v33 = vsub.f32 %v438_v28, %v201_v10 }
 0x210   :  { %v192_v4 = vpop.permute.xlu1 %191 }
 0x211   :  { %v196_v5 = vmul.f32 %v192_v4, %v399_v11  ;;  %v194_v6 = vmul.f32 %v192_v4, %v404_v12  ;;  %v195_v7 = vmul.f32 %v192_v4, %v424_v17  ;;  %v197_v8 = vmul.f32 %v192_v4, %v419_v16 }
 0x212   :  { %v203_v12 = vsub.f32 %v442_v32, %v201_v10 }
 0x213   :  { %219 = vperm.xlu0 %341, %v196_v5   ;;  %209 = vperm.xlu1 %340, %v194_v6  }
 0x217   :  { %214 = vperm.xlu1 %340, %v195_v7   ;;  %342 = vset.pattern.permute.xlu0 %v349_v58 }
 0x218   :  { %236 = vperm.xlu0 %342, %v424_v17   ;;  %v204_v17 = vsub.f32 %v436_v27, %v201_v10 }
 0x21b   :  { %343 = vset.pattern.permute.xlu1 %v349_v58 }
 0x21c   :  { %240 = vperm.xlu1 %343, %v399_v11  }
 0x220   :  { %344 = vset.pattern.permute.xlu1 %v350_v2 }
 0x221   :  { %224 = vperm.xlu1 %344, %v197_v8   ;;  %v233_v9 = vpop.permute.xlu1 %232 }
 0x225   :  { %345 = vset.pattern.permute.xlu1 %v349_v58 }
 0x226   :  { %244 = vperm.xlu1 %345, %v419_v16  }
 0x292   :  { %v210_v13 = vpop.permute.xlu1 %209  ;;  %v220_v15 = vpop.permute.xlu0 %219 }
 0x293   :  { %v227_v14 = vmul.f32 %v210_v13, %v203_v12  ;;  %v229_v16 = vmul.f32 %v220_v15, %v205_v22 }
 0x295   :  { %v247_v18 = vadd.f32 %v233_v9, %v227_v14 }
 0x296   :  { %v215_v19 = vpop.permute.xlu1 %214 }
 0x297   :  { %vm251_vm2 = vcmp.ge.f32.partialorder %v247_v18, 0.0  ;;  %v255_v11 = vmul.f32 0.01, %v247_v18  ;;  %v228_v20 = vmul.f32 %v215_v19, %v204_v17  ;;  %v237_v21 = vpop.permute.xlu0 %236 }
 0x299   :  { %v259_v23 = vsel %vm251_vm2, %v247_v18, %v255_v11  ;;  %v248_v24 = vadd.f32 %v237_v21, %v228_v20 }
 0x29a   :  { %263 = vst.msk [vmem:[%s495_s3] sm:$0xff] %vm148_vm1, %v259_v23 }
 0x29b   :  { %vm252_vm3 = vcmp.ge.f32.partialorder %v248_v24, 0.0  ;;  %v256_v25 = vmul.f32 0.01, %v248_v24  ;;  %v241_v26 = vpop.permute.xlu1 %240 }
 0x29c   :  { %v249_v29 = vadd.f32 %v241_v26, %v229_v16 }
 0x29d   :  { %v260_v27 = vsel %vm252_vm3, %v248_v24, %v256_v25 }
 0x29e   :  { %264 = vst.msk [vmem:[%s495_s3 + $0x8] sm:$0xff] %vm148_vm1, %v260_v27  ;;  %vm253_vm4 = vcmp.ge.f32.partialorder %v249_v29, 0.0  ;;  %v257_v30 = vmul.f32 0.01, %v249_v29 }
 0x2a0   :  { %v261_v31 = vsel %vm253_vm4, %v249_v29, %v257_v30  ;;  %v225_v32 = vpop.permute.xlu1 %224 }
 0x2a1   :  { %265 = vst.msk [vmem:[%s495_s3 + $0x10] sm:$0xff] %vm148_vm1, %v261_v31  ;;  %v230_v34 = vmul.f32 %v225_v32, %v206_v33 }
 0x2a5   :  { %v245_v35 = vpop.permute.xlu1 %244 }
 0x2a6   :  { %v250_v36 = vadd.f32 %v245_v35, %v230_v34 }
 0x2a8   :  { %vm254_vm5 = vcmp.ge.f32.partialorder %v250_v36, 0.0  ;;  %v258_v37 = vmul.f32 0.01, %v250_v36 }
 0x2aa   :  { %v262_v38 = vsel %vm254_vm5, %v250_v36, %v258_v37 }
 0x2ab   :  { %266 = vst.msk [vmem:[%s495_s3 + $0x18] sm:$0xff] %vm148_vm1, %v262_v38 }

// kernel: vae_forward.14
= control target key start
LH: loop header
LB: loop body
LE: loop exit
PB: predicated region body
PF: predicated region fallthrough
CT: control target
= control target key end

     0   :  { %vm46_vm0 = vcmask 261120   ;;  %v311_v3 = vmov 0   ;;  %v312_v44 = vmov 2   ;;  %v313_v52 = vmov 1   ;;  %s425_s0 = inlined_call_operand.vmem [shape: f32[32,128], index: 0, kind: input, shape index: {}]   ;;  %s426_s1 = inlined_call_operand.vmem [shape: f32[32,32], index: 1, kind: input, shape index: {}]   ;;  %s427_s2 = inlined_call_operand.vmem [shape: f32[32,3], index: 2, kind: input, shape index: {}]   ;;  %s428_s3 = inlined_call_operand.vmem [shape: f32[32,128], index: 3, kind: output, shape index: {}]  }
   0x1   :  { %v18_v0 = vld [vmem:[%s425_s0] sm:$0xff]  ;;  %v19_v1 = vld [vmem:[%s425_s0 + $0x8] sm:$0xff]  ;;  %v20_v2 = vld [vmem:[%s425_s0 + $0x10] sm:$0xff]  ;;  %301 = vset.pattern.permute.xlu1 %v311_v3  ;;  %300 = vset.pattern.permute.xlu0 %v311_v3 }
   0x2   :  { %v284_v4 = vpack.c.bf16 %v19_v1, %v18_v0  ;;  %v21_v5 = vld [vmem:[%s425_s0 + $0x18] sm:$0xff]  ;;  %v14_v6 = vld [vmem:[%s426_s1] sm:$0xff]  ;;  %v16_v7 = vld [vmem:[%s426_s1 + $0x10] sm:$0xff] }
   0x3   :  { %v288_v8 = vpack.c.bf16 %v21_v5, %v20_v2  ;;  %278 = vmatprep.mubr.msk.f32.mxu0 %vm46_vm0, %v14_v6  ;;  %281 = vmatprep.mubr.msk.f32.mxu1 %vm46_vm0, %v16_v7  ;;  %v358_v9 = vld [vmem:[%s427_s2 + $0x10] sm:$0xff]  ;;  %v363_v10 = vld [vmem:[%s427_s2] sm:$0xff]  ;;  %v370_v11 = vld [vmem:[%s427_s2 + $0x18] sm:$0xff] }
   0x4   :  { %285 = vmatprep.subr.bf16.mxu0 %v284_v4  ;;  %292 = vmatprep.subr.bf16.mxu1 %v284_v4  ;;  %v375_v12 = vld [vmem:[%s427_s2 + $0x8] sm:$0xff]  ;;  %v17_v14 = vld [vmem:[%s426_s1 + $0x18] sm:$0xff] }
   0x5   :  { %287 = vmatpush3.bf16.msra.mxu0 %v284_v4  ;;  %294 = vmatpush3.bf16.msra.mxu1 %v284_v4  ;;  %v15_v13 = vld [vmem:[%s426_s1 + $0x8] sm:$0xff]  ;;  %s314_s1 = smov 1  }
   0x6   :  { %289 = vmatprep.subr.bf16.mxu0 %v288_v8  ;;  %293 = vmatprep.subr.bf16.mxu1 %v288_v8 }
   0x7   :  { %38 = vperm.xlu1 %301, %v358_v9   ;;  %28 = vperm.xlu0 %300, %v363_v10  }
   0x9   :  { %291 = vmatpush3.bf16.msra.mxu0 %v288_v8  ;;  %295 = vmatpush3.bf16.msra.mxu1 %v288_v8 }
   0xb   :  { %43 = vperm.xlu1 %301, %v370_v11   ;;  %33 = vperm.xlu0 %300, %v375_v12  }
   0xc   :  { %279 = vmatmul.mubr.msk.f32.vlgmr.msra.gmra.mrb[0].mxu0 %vm46_vm0, %v15_v13  ;;  %282 = vmatmul.mubr.msk.f32.vlgmr.msra.gmra.mrb[0].mxu1 %vm46_vm0, %v17_v14 }
   0xf   :  { %302 = vset.pattern.permute.xlu1 %v312_v44 }
  0x86   :  { %v29_v15 = vpop.permute.xlu0 %28  ;;  %v39_v16 = vpop.permute.xlu1 %38 }
  0x8a   :  { %v34_v17 = vpop.permute.xlu0 %33  ;;  %v44_v18 = vpop.permute.xlu1 %43 }
  0xdf   :  { %v280_v19 = vpop.f32.mrb[0].mxu0  ;;  %v283_v20 = vpop.f32.mrb[0].mxu1 }
  0xe0   :  { %v387_v21 = vadd.f32 %v280_v19, %v34_v17  ;;  %v389_v22 = vadd.f32 %v283_v20, %v44_v18  ;;  %v135_v23 = vpop.f32.mrb[1].mxu1  ;;  %v125_v24 = vpop.f32.mrb[1].mxu0 }
  0xe1   :  { %v395_v26 = vadd.f32 %v135_v23, %v39_v16  ;;  %v126_v27 = vadd.f32 %v125_v24, %v29_v15 }
  0xe2   :  { %150 = vadd.xlane.f32.xlu0 %v389_v22  ;;  %146 = vadd.xlane.f32.xlu1 %v387_v21  ;;  %v153_v25 = vmul.f32 %v387_v21, %v387_v21  ;;  %v155_v30 = vmul.f32 %v389_v22, %v389_v22 }
  0xe3   :  { %v154_v28 = vmul.f32 %v395_v26, %v395_v26  ;;  %v152_v29 = vmul.f32 %v126_v27, %v126_v27 }
  0xe6   :  { %158 = vadd.xlane.f32.xlu1 %v153_v25  ;;  %144 = vadd.xlane.f32.xlu0 %v126_v27 }
  0xea   :  { %160 = vadd.xlane.f32.xlu1 %v154_v28  ;;  %148 = vadd.xlane.f32.xlu0 %v395_v26 }
  0xee   :  { %156 = vadd.xlane.f32.xlu0 %v152_v29 }
  0xf2   :  { %162 = vadd.xlane.f32.xlu0 %v155_v30 }
 0x16f   :  { %v151_v31 = vpop.xlane.xlu0 %150  ;;  %v147_v32 = vpop.xlane.xlu1 %146 }
 0x173   :  { %v145_v33 = vpop.xlane.xlu0 %144  ;;  %v159_v35 = vpop.xlane.xlu1 %158 }
 0x174   :  { %v164_v34 = vadd.f32 %v147_v32, %v145_v33 }
 0x177   :  { %v149_v36 = vpop.xlane.xlu0 %148  ;;  %v161_v42 = vpop.xlane.xlu1 %160 }
 0x178   :  { %v165_v37 = vadd.f32 %v164_v34, %v149_v36 }
 0x17a   :  { %v166_v38 = vadd.f32 %v165_v37, %v151_v31 }
 0x17b   :  { %v157_v39 = vpop.xlane.xlu0 %156 }
 0x17c   :  { %v170_v40 = vmul.f32 0.001953125, %v166_v38  ;;  %v167_v41 = vadd.f32 %v159_v35, %v157_v39 }
 0x17e   :  { %187 = vperm.xlu0 %300, %v170_v40   ;;  %v168_v43 = vadd.f32 %v167_v41, %v161_v42  ;;  %v172_v47 = vmul.f32 %v170_v40, %v170_v40 }
 0x17f   :  { %v163_v45 = vpop.xlane.xlu0 %162 }
 0x180   :  { %v169_v46 = vadd.f32 %v168_v43, %v163_v45 }
 0x182   :  { %v171_v48 = vmul.f32 0.001953125, %v169_v46  ;;  %304 = vset.pattern.permute.xlu0 %v313_v52 }
 0x184   :  { %v173_v49 = vsub.f32 %v171_v48, %v172_v47 }
 0x186   :  { %v174_v50 = vmax.f32 %v173_v49, 0.0 }
 0x188   :  { %v175_v51 = vadd.f32 1e-05, %v174_v50 }
 0x18a   :  { %309 = vrsqrt.f32 %v175_v51 }
 0x194   :  { %v310_v53 = vpop.eup %309 }
 0x195   :  { %178 = vrot.lane.b32.xlu1 %v310_v53, %s314_s1 }
 0x199   :  { %219 = vperm.xlu1 %302, %v363_v10  }
 0x19d   :  { %303 = vset.pattern.permute.xlu1 %v313_v52 }
 0x1fd   :  { %v188_v60 = vpop.permute.xlu0 %187 }
 0x1fe   :  { %v190_v61 = vsub.f32 %v126_v27, %v188_v60  ;;  %v191_v2 = vsub.f32 %v387_v21, %v188_v60  ;;  %v192_v7 = vsub.f32 %v395_v26, %v188_v60  ;;  %v193_v18 = vsub.f32 %v389_v22, %v188_v60 }
 0x207   :  { %v179_v54 = vpop.permute.xlu1 %178 }
 0x208   :  { %v183_v55 = vmul.f32 %v179_v54, %v358_v9  ;;  %v181_v56 = vmul.f32 %v179_v54, %v363_v10  ;;  %v182_v57 = vmul.f32 %v179_v54, %v375_v12  ;;  %v184_v58 = vmul.f32 %v179_v54, %v370_v11 }
 0x20a   :  { %206 = vperm.xlu0 %304, %v183_v55   ;;  %196 = vperm.xlu1 %303, %v181_v56  }
 0x20e   :  { %201 = vperm.xlu1 %303, %v182_v57   ;;  %305 = vset.pattern.permute.xlu0 %v312_v44 }
 0x20f   :  { %223 = vperm.xlu0 %305, %v375_v12  }
 0x212   :  { %306 = vset.pattern.permute.xlu1 %v312_v44 }
 0x213   :  { %227 = vperm.xlu1 %306, %v358_v9  }
 0x217   :  { %307 = vset.pattern.permute.xlu1 %v313_v52 }
 0x218   :  { %211 = vperm.xlu1 %307, %v184_v58   ;;  %v220_v59 = vpop.permute.xlu1 %219 }
 0x21c   :  { %308 = vset.pattern.permute.xlu1 %v312_v44 }
 0x21d   :  { %231 = vperm.xlu1 %308, %v370_v11  }
 0x289   :  { %v197_v62 = vpop.permute.xlu1 %196  ;;  %v207_v0 = vpop.permute.xlu0 %206 }
 0x28a   :  { %v214_v63 = vmul.f32 %v197_v62, %v190_v61  ;;  %v216_v10 = vmul.f32 %v207_v0, %v192_v7 }
 0x28c   :  { %v234_v1 = vadd.f32 %v220_v59, %v214_v63 }
 0x28d   :  { %v202_v3 = vpop.permute.xlu1 %201 }
 0x28e   :  { %vm238_vm1 = vcmp.ge.f32.partialorder %v234_v1, 0.0  ;;  %v242_v4 = vmul.f32 0.01, %v234_v1  ;;  %v215_v5 = vmul.f32 %v202_v3, %v191_v2  ;;  %v224_v6 = vpop.permute.xlu0 %223 }
 0x290   :  { %v246_v8 = vsel %vm238_vm1, %v234_v1, %v242_v4  ;;  %v235_v9 = vadd.f32 %v224_v6, %v215_v5 }
 0x291   :  { %250 = vst [vmem:[%s428_s3] sm:$0xff] %v246_v8 }
 0x292   :  { %vm239_vm2 = vcmp.ge.f32.partialorder %v235_v9, 0.0  ;;  %v243_v11 = vmul.f32 0.01, %v235_v9  ;;  %v228_v12 = vpop.permute.xlu1 %227 }
 0x293   :  { %v236_v13 = vadd.f32 %v228_v12, %v216_v10 }
 0x294   :  { %v247_v14 = vsel %vm239_vm2, %v235_v9, %v243_v11 }
 0x295   :  { %251 = vst [vmem:[%s428_s3 + $0x8] sm:$0xff] %v247_v14  ;;  %vm240_vm3 = vcmp.ge.f32.partialorder %v236_v13, 0.0  ;;  %v244_v15 = vmul.f32 0.01, %v236_v13 }
 0x297   :  { %v248_v16 = vsel %vm240_vm3, %v236_v13, %v244_v15  ;;  %v212_v17 = vpop.permute.xlu1 %211 }
 0x298   :  { %252 = vst [vmem:[%s428_s3 + $0x10] sm:$0xff] %v248_v16  ;;  %v217_v19 = vmul.f32 %v212_v17, %v193_v18 }
 0x29c   :  { %v232_v20 = vpop.permute.xlu1 %231 }
 0x29d   :  { %v237_v21 = vadd.f32 %v232_v20, %v217_v19 }
 0x29f   :  { %vm241_vm4 = vcmp.ge.f32.partialorder %v237_v21, 0.0  ;;  %v245_v23 = vmul.f32 0.01, %v237_v21 }
 0x2a1   :  { %v249_v24 = vsel %vm241_vm4, %v237_v21, %v245_v23 }
 0x2a2   :  { %253 = vst [vmem:[%s428_s3 + $0x18] sm:$0xff] %v249_v24 }

// kernel: vae_forward.15
= control target key start
LH: loop header
LB: loop body
LE: loop exit
PB: predicated region body
PF: predicated region fallthrough
CT: control target
= control target key end

     0   :  { %v266_v3 = vmov 0.0   ;;  %v267_v8 = vmov 0   ;;  %vm57_vm0 = vcmask 588800   ;;  %s408_s0 = inlined_call_operand.vmem [shape: f32[72,512], index: 0, kind: input, shape index: {}]   ;;  %s409_s2 = inlined_call_operand.vmem [shape: f32[4,1], index: 2, kind: input, shape index: {}]   ;;  %s410_s1 = inlined_call_operand.vmem [shape: f32[4,72], index: 1, kind: input, shape index: {}]   ;;  %s411_s3 = inlined_call_operand.vmem [shape: f32[4,512], index: 3, kind: output, shape index: {}]  }
   0x1   :  { %v16_v0 = vld [vmem:[%s408_s0 + $0x8] sm:$0xff]  ;;  %v18_v2 = vld [vmem:[%s408_s0 + $0x18] sm:$0xff]  ;;  %125 = vmatprep.mubr.f32.mxu0 %v266_v3  ;;  %196 = vmatprep.mubr.f32.mxu1 %v266_v3  ;;  %v15_v6 = vld [vmem:[%s408_s0] sm:$0xff] }
   0x2   :  { %v20_v1 = vld [vmem:[%s408_s0 + $0x28] sm:$0xff]  ;;  %v22_v5 = vld [vmem:[%s408_s0 + $0x38] sm:$0xff]  ;;  %v19_v7 = vld [vmem:[%s408_s0 + $0x20] sm:$0xff]  ;;  %257 = vset.pattern.permute.xlu0 %v267_v8 }
   0x3   :  { %v223_v4 = vpack.c.bf16 %v20_v1, %v16_v0  ;;  %v239_v9 = vpack.c.bf16 %v22_v5, %v18_v2  ;;  %v225_v10 = vpack.c.bf16 %v19_v7, %v15_v6  ;;  %v17_v11 = vld [vmem:[%s408_s0 + $0x10] sm:$0xff]  ;;  %v24_v13 = vld [vmem:[%s408_s0 + $0x48] sm:$0xff]  ;;  %v26_v16 = vld [vmem:[%s408_s0 + $0x58] sm:$0xff] }
   0x4   :  { %v21_v12 = vld [vmem:[%s408_s0 + $0x30] sm:$0xff]  ;;  %v28_v15 = vld [vmem:[%s408_s0 + $0x68] sm:$0xff]  ;;  %v30_v17 = vld [vmem:[%s408_s0 + $0x78] sm:$0xff] }
   0x5   :  { %224 = vmatprep.subr.bf16.mxu0 %v223_v4  ;;  %v241_v14 = vpack.c.bf16 %v21_v12, %v17_v11  ;;  %240 = vmatprep.subr.bf16.mxu1 %v239_v9  ;;  %v227_v18 = vpack.c.bf16 %v28_v15, %v24_v13  ;;  %v243_v19 = vpack.c.bf16 %v30_v17, %v26_v16  ;;  %v23_v20 = vld [vmem:[%s408_s0 + $0x40] sm:$0xff]  ;;  %v25_v22 = vld [vmem:[%s408_s0 + $0x50] sm:$0xff]  ;;  %v32_v25 = vld [vmem:[%s408_s0 + $0x88] sm:$0xff] }
   0x6   :  { %226 = vmatpush1.bf16.msra.mxu0 %v225_v10  ;;  %v27_v21 = vld [vmem:[%s408_s0 + $0x60] sm:$0xff]  ;;  %v29_v24 = vld [vmem:[%s408_s0 + $0x70] sm:$0xff]  ;;  %v36_v26 = vld [vmem:[%s408_s0 + $0xa8] sm:$0xff] }
   0x7   :  { %242 = vmatpush1.bf16.msra.mxu1 %v241_v14  ;;  %v229_v23 = vpack.c.bf16 %v27_v21, %v23_v20  ;;  %228 = vmatprep.subr.bf16.mxu0 %v227_v18  ;;  %v245_v27 = vpack.c.bf16 %v29_v24, %v25_v22  ;;  %v231_v28 = vpack.c.bf16 %v36_v26, %v32_v25  ;;  %v34_v29 = vld [vmem:[%s408_s0 + $0x98] sm:$0xff]  ;;  %v31_v31 = vld [vmem:[%s408_s0 + $0x80] sm:$0xff]  ;;  %v33_v34 = vld [vmem:[%s408_s0 + $0x90] sm:$0xff] }
   0x8   :  { %244 = vmatprep.subr.bf16.mxu1 %v243_v19  ;;  %v38_v30 = vld [vmem:[%s408_s0 + $0xb8] sm:$0xff]  ;;  %v35_v33 = vld [vmem:[%s408_s0 + $0xa0] sm:$0xff]  ;;  %v37_v35 = vld [vmem:[%s408_s0 + $0xb0] sm:$0xff] }
   0x9   :  { %v247_v32 = vpack.c.bf16 %v38_v30, %v34_v29  ;;  %v233_v36 = vpack.c.bf16 %v35_v33, %v31_v31  ;;  %v40_v37 = vld [vmem:[%s408_s0 + $0xc8] sm:$0xff]  ;;  %v42_v39 = vld [vmem:[%s408_s0 + $0xd8] sm:$0xff]  ;;  %v249_v40 = vpack.c.bf16 %v37_v35, %v33_v34  ;;  %v39_v43 = vld [vmem:[%s408_s0 + $0xc0] sm:$0xff] }
   0xa   :  { %230 = vmatpush1.bf16.msra.mxu0 %v229_v23  ;;  %v44_v38 = vld [vmem:[%s408_s0 + $0xe8] sm:$0xff]  ;;  %v46_v42 = vld [vmem:[%s408_s0 + $0xf8] sm:$0xff]  ;;  %v43_v44 = vld [vmem:[%s408_s0 + $0xe0] sm:$0xff] }
   0xb   :  { %246 = vmatpush1.bf16.msra.mxu1 %v245_v27  ;;  %232 = vmatprep.subr.bf16.mxu0 %v231_v28  ;;  %v235_v41 = vpack.c.bf16 %v44_v38, %v40_v37  ;;  %v251_v45 = vpack.c.bf16 %v46_v42, %v42_v39  ;;  %v41_v46 = vld [vmem:[%s408_s0 + $0xd0] sm:$0xff]  ;;  %v237_v48 = vpack.c.bf16 %v43_v44, %v39_v43  ;;  %v51_v49 = vld [vmem:[%s409_s2] sm:$0xf]  ;;  %v48_v51 = vld [vmem:[%s408_s0 + $0x108] sm:$0xff] }
   0xc   :  { %248 = vmatprep.subr.bf16.mxu1 %v247_v32  ;;  %v45_v47 = vld [vmem:[%s408_s0 + $0xf0] sm:$0xff]  ;;  %54 = vperm.xlu0 %257, %v51_v49   ;;  %v50_v52 = vld [vmem:[%s408_s0 + $0x118] sm:$0xff]  ;;  %v47_v53 = vld [vmem:[%s408_s0 + $0x100] sm:$0xff] }
   0xd   :  { %v253_v50 = vpack.c.bf16 %v45_v47, %v41_v46  ;;  %v49_v54 = vld [vmem:[%s408_s0 + $0x110] sm:$0xff]  ;;  %v14_v55 = vld [vmem:[%s410_s1] sm:$0xf] }
   0xe   :  { %234 = vmatpush1.bf16.msra.mxu0 %v233_v36 }
   0xf   :  { %250 = vmatpush1.bf16.msra.mxu1 %v249_v40  ;;  %236 = vmatprep.subr.bf16.mxu0 %v235_v41 }
  0x10   :  { %252 = vmatprep.subr.bf16.mxu1 %v251_v45 }
  0x12   :  { %238 = vmatpush1.bf16.msra.mxu0 %v237_v48 }
  0x13   :  { %254 = vmatpush1.bf16.msra.mxu1 %v253_v50  ;;  %77 = vmatprep.subr.mxu0 %v48_v51 }
  0x14   :  { %148 = vmatprep.subr.mxu1 %v50_v52 }
  0x16   :  { %78 = vmatpush1.msra.mxu0 %v47_v53 }
  0x17   :  { %149 = vmatpush1.msra.mxu1 %v49_v54  ;;  %221 = vmatmul.mubr.msk.f32.vlgmr.msra.gmra.mrb[0].mxu0 %vm57_vm0, %v14_v55 }
  0x18   :  { %222 = vmatmul.mubr.msk.f32.vlgmr.msra.gmra.mrb[0].mxu1 %vm57_vm0, %v14_v55 }
  0x8b   :  { %v55_v56 = vpop.permute.xlu0 %54 }
  0xea   :  { %v127_v57 = vpop.f32.mrb[0].mxu0 }
  0xeb   :  { %v128_v58 = vadd.f32 %v127_v57, %v55_v56  ;;  %v198_v59 = vpop.f32.mrb[0].mxu1  ;;  %v129_v60 = vpop.f32.mrb[1].mxu0 }
  0xec   :  { %v199_v61 = vadd.f32 %v198_v59, %v55_v56  ;;  %v130_v62 = vadd.f32 %v129_v60, %v55_v56  ;;  %v200_v63 = vpop.f32.mrb[1].mxu1 }
  0xed   :  { %258 = vtanh.f32 %v128_v58  ;;  %v201_v0 = vadd.f32 %v200_v63, %v55_v56 }
  0xee   :  { %260 = vtanh.f32 %v199_v61 }
  0xef   :  { %262 = vtanh.f32 %v130_v62 }
  0xf0   :  { %264 = vtanh.f32 %v201_v0 }
  0xf7   :  { %v259_v1 = vpop.eup %258 }
  0xf8   :  { %v261_v2 = vpop.eup %260 }
  0xf9   :  { %v263_v3 = vpop.eup %262 }
  0xfa   :  { %v265_v4 = vpop.eup %264  ;;  %v211_v5 = vcombine.low %v259_v1, %v263_v3 }
  0xfb   :  { %v212_v6 = vcombine.low %v261_v2, %v265_v4 }
  0xfc   :  { %215 = vst [vmem:[%s411_s3] sm:$0xff] %v211_v5 }
  0xfd   :  { %216 = vst [vmem:[%s411_s3 + $0x8] sm:$0xff] %v212_v6 }

</bundles_post_ra>
